<compile_context>
chip_gen: v7x
topology: tpu7x:2x2x1
jax: 0.10.0
libtpu: 0.0.40
codegen_flags: <defaults>
</compile_context>

<pallas_src>
import jax
import jax.numpy as jnp
import numpy as np
from jax.experimental import pallas as pl
from jax.experimental.pallas import tpu as pltpu


def _make_kernel(exp_dtype):
    """Build the kernel body; exp_dtype is f32 (v5e and older) or bf16 (v6e/v7x)."""

    def kernel(dm_ref, ax_ref, ay_ref, v_ref, o_ref, vt_ref):
        # Block shapes seen by the kernel:
        #   dm_ref : (S, S)         dm[i, k] = -(shift*(k-i)^2 + bias)
        #   ax_ref : (1, TR, S, S)  atten_x[b, r, c, k]      (row tile)
        #   ay_ref : (1, S, TR, S)  atten_y[b, c, r, k]      (row tile on dim 2)
        #   v_ref  : (1, S, S, D)   V[b, k, c, d]            (full, re-DMA'd per batch)
        #   o_ref  : (1, TR, S, D)  out[b, r, c, d]
        #   vt_ref : (S, S, D) bf16 scratch: V^T[c, k, d] = V[k, c, d]
        TR = ax_ref.shape[1]
        t = pl.program_id(1)

        # Build the transposed copy of V[b] once per batch (first row tile). The t
        # axis is marked "arbitrary" so every later row tile of this batch (on this
        # core) sees the initialized scratch.
        @pl.when(t == 0)
        def _():
            vt_ref[...] = jnp.transpose(v_ref[0], (1, 0, 2)).astype(vt_ref.dtype)

        r0 = pl.multiple_of(t * TR, TR)

        def exp_and_sum(logits):
            # Unnormalized softmax (flash style): exp field (<= 1 after max-sub, safe
            # in bf16 for the MXU) + f32 denominator. exp runs on the EUP slot.
            m = jnp.max(logits, axis=-1, keepdims=True)
            e = jnp.exp((logits - m).astype(exp_dtype))
            l = jnp.sum(e, axis=-1, keepdims=True, dtype=jnp.float32)
            return e.astype(jnp.bfloat16), l

        # x path: logits[r, c, k] = atten_x[b, r, c, k] + dm[c, k]
        p_x, l_x = exp_and_sum(ax_ref[0] + dm_ref[...][None, :, :])          # (TR,S,S)
        # y path: logits[c, r, k] = atten_y[b, c, r, k] + dm[r, k]  (rows of this tile)
        p_y, l_y = exp_and_sum(ay_ref[0] + dm_ref[pl.ds(r0, TR), :][None, :, :])  # (S,TR,S)

        # x-path V rows come straight out of the per-batch VMEM block (no extra HBM read).
        v_rows = v_ref[0, pl.ds(r0, TR), :, :].astype(jnp.bfloat16)          # (TR,S,D)

        # Canonical batched matmuls, bf16 operands, f32 accumulation on the MXU.
        # out1[r, c, d] = sum_k p_x[r, c, k] * V[r, k, d]
        out1 = jnp.einsum('rck,rkd->rcd', p_x, v_rows,
                          preferred_element_type=jnp.float32)                # (TR,S,D)
        # out2[c, r, d] = sum_k p_y[c, r, k] * V^T[c, k, d]
        out2 = jnp.einsum('crk,ckd->crd', p_y, vt_ref[...],
                          preferred_element_type=jnp.float32)                # (S,TR,D)

        # Normalize AFTER the matmul, in f32, on the (.., D) results: D lanes instead
        # of S lanes per row; reciprocal goes to the EUP slot.
        out1 = out1 * pl.reciprocal(l_x, approx=True)
        out2 = out2 * pl.reciprocal(l_y, approx=True)

        o_ref[0] = (out1 + jnp.transpose(out2, (1, 0, 2))).astype(o_ref.dtype)

    return kernel


def _exp_dtype():
    """bf16 exp on v6e/v7x (bf16-capable EUP/VPU); f32 on v5e and anything unknown."""
    try:
        kind = jax.devices()[0].device_kind.lower()
    except Exception:
        return jnp.float32
    if ("v6" in kind) or ("v7" in kind):
        return jnp.bfloat16
    return jnp.float32


def _vmem_budget_and_limit(user_budget=None):
    """Generation-aware VMEM budget (for tile search) and vmem_limit_bytes."""
    try:
        cap = int(pltpu.get_tpu_info().vmem_capacity_bytes)
    except Exception:
        cap = 0
    if cap <= 0:
        cap = 64 * 1024 * 1024            # conservative fallback (v7x per-TC VMEM)
    headroom = 12 * 1024 * 1024           # Mosaic internal scratch / spill slack
    limit = max(cap - headroom, 32 * 1024 * 1024)
    budget = int(limit * 0.85)
    if user_budget is not None:
        budget = min(int(user_budget), budget)   # never exceed the generation's VMEM
    return budget, limit


def _pick_row_tile(B, S, D, vmem_budget_bytes):
    """Largest legal row tile TR whose double-buffered blocks + persistent scratch +
    live intermediates fit the budget; prefer TR whose strided y-path DMA runs are
    >= 8 KiB, and (secondarily) TR that leaves >= 4 grid steps for the pipeline /
    megacore to overlap."""
    F32, BF16 = 4, 2

    def footprint(tr):
        blocks = 2 * F32 * (tr * S * S        # atten_x tile (double-buffered)
                            + tr * S * S      # atten_y tile
                            + S * S * D       # full V (re-DMA'd only when b changes)
                            + tr * S * D      # output tile
                            + S * S)          # dm
        scratch = BF16 * S * S * D            # persistent transposed-V copy
        live = (2 * F32 * tr * S * S          # two f32 logit fields
                + 2 * BF16 * tr * S * S       # two bf16 prob fields
                + 2 * F32 * tr * S * D        # out1 / out2 (f32 accumulators)
                + BF16 * tr * S * D)          # bf16 V row slice
        return blocks + scratch + live

    # TR must divide S and be a multiple of 8 (or equal S) for the (TR, S) dims.
    cands = sorted({t for t in range(8, S + 1, 8) if S % t == 0} | {S})
    fitting = [t for t in cands if footprint(t) <= vmem_budget_bytes] or [cands[0]]
    # y-path block (1,S,TR,S) gathers S runs of TR*S*4 bytes: keep runs >= ~8 KiB.
    pool = [t for t in fitting if t * S * 4 >= 8192] or fitting
    busy = [t for t in pool if B * (S // t) >= 4]
    return max(busy) if busy else max(pool)


def gaussian_trans(shift, bias, atten_x_full, atten_y_full, value_full,
                   *, vmem_budget_bytes=None):
    B, S = atten_x_full.shape[:2]
    D = value_full.shape[-1]
    assert atten_x_full.shape == (B, S, S, S), "GaussianTrans requires H == W"
    assert atten_y_full.shape == (B, S, S, S)
    assert value_full.shape == (B, S, S, D)

    budget, vmem_limit = _vmem_budget_and_limit(vmem_budget_bytes)
    TR = _pick_row_tile(B, S, D, budget)
    exp_dtype = _exp_dtype()

    # Gaussian distance bias, computed once outside the kernel:
    #   dm[i, k] = -(shift * (k - i)^2 + bias)
    idx = jnp.arange(S, dtype=jnp.float32)
    diff = idx[None, :] - idx[:, None]
    dm = (-(shift * diff * diff + bias)).astype(jnp.float32).reshape(S, S)

    itemsize = 4
    cost = pl.CostEstimate(
        flops=4 * B * S * S * S * D,               # two (S x S)@(S x D) per (b, r/c)
        transcendentals=2 * B * S * S * S,         # the two softmax exp fields
        bytes_accessed=itemsize * (2 * B * S ** 3        # attention reads (dominant)
                                   + B * S * S * D       # V read once per batch
                                   + B * S * S * D       # output write
                                   + S * S),             # dm
    )

    out = pl.pallas_call(
        _make_kernel(exp_dtype),
        out_shape=jax.ShapeDtypeStruct((B, S, S, D), value_full.dtype),
        grid=(B, S // TR),
        in_specs=[
            pl.BlockSpec((S, S), lambda b, t: (0, 0)),               # dm (full, constant)
            pl.BlockSpec((1, TR, S, S), lambda b, t: (b, t, 0, 0)),  # atten_x_full
            pl.BlockSpec((1, S, TR, S), lambda b, t: (b, 0, t, 0)),  # atten_y_full (r on dim 2)
            pl.BlockSpec((1, S, S, D), lambda b, t: (b, 0, 0, 0)),   # V (full, once per batch)
        ],
        out_specs=pl.BlockSpec((1, TR, S, D), lambda b, t: (b, t, 0, 0)),
        scratch_shapes=[pltpu.VMEM((S, S, D), jnp.bfloat16)],        # V^T[c,k,d] per batch
        compiler_params=pltpu.CompilerParams(
            # The row-tile axis carries the per-batch V^T scratch dependency (t==0
            # initializes it), so it must stay sequential; megacore splits over b.
            dimension_semantics=("parallel", "arbitrary"),
            vmem_limit_bytes=int(vmem_limit),
        ),
        cost_estimate=cost,
    )(dm, atten_x_full, atten_y_full, value_full)
    return out


def gaussian_trans_reference(atten_x_full, atten_y_full, value_full, shift, bias):
    """Pure-JAX f32 reference mirroring the PyTorch loop semantics."""
    S = atten_x_full.shape[1]
    idx = jnp.arange(S, dtype=jnp.float32)
    dm = -(shift * (idx[None, :] - idx[:, None]) ** 2 + bias)            # dm[i, k]
    a_x = jax.nn.softmax(atten_x_full + dm[None, None, :, :], axis=-1)   # [b,r,c,k]+dm[c,k]
    a_y = jax.nn.softmax(atten_y_full + dm[None, None, :, :], axis=-1)   # [b,c,r,k]+dm[r,k]
    out1 = jnp.einsum('brck,brkd->brcd', a_x, value_full)
    out2 = jnp.einsum('bcrk,bkcd->brcd', a_y, value_full)
    return out1 + out2


if __name__ == "__main__":
    B, S, D = 2, 16, 32

    key = jax.random.PRNGKey(0)
    k_bias, k_shift, k_x, k_ax, k_ay, k_v = jax.random.split(key, 6)

    # Parameters, matching nn.Parameter(-|randn(1)|) and nn.Parameter(|randn(1)|).
    bias = -jnp.abs(jax.random.normal(k_bias, (1,), dtype=jnp.float32))
    shift = jnp.abs(jax.random.normal(k_shift, (1,), dtype=jnp.float32))

    # Inputs (x is only consulted for its spatial shape in the reference forward).
    x = jax.random.normal(k_x, (B, S, S, D), dtype=jnp.float32)
    atten_x_full = jax.random.normal(k_ax, (B, S, S, S), dtype=jnp.float32)
    atten_y_full = jax.random.normal(k_ay, (B, S, S, S), dtype=jnp.float32)
    value_full = jax.random.normal(k_v, (B, S, S, D), dtype=jnp.float32)
    assert x.shape[1] == x.shape[2] == S  # square spatial, as the torch code requires

    fn = jax.jit(gaussian_trans)
    out = jax.block_until_ready(fn(shift, bias, atten_x_full, atten_y_full, value_full))

    ref = gaussian_trans_reference(atten_x_full, atten_y_full, value_full,
                                   shift[0], bias[0])
    # bf16 probabilities/V on the MXU (f32 accumulation + exact-style f32 post-matmul
    # normalization) -> ~1e-2-level absolute error vs. the pure-f32 reference.
    np.testing.assert_allclose(np.asarray(out), np.asarray(ref), rtol=5e-2, atol=5e-2)

    print("KERNEL_OK")
</pallas_src>

<mosaic_0001>
module attributes {stable_mosaic.version = 11 : i64} {
  func.func @kernel(%arg0: i32, %arg1: i32, %arg2: memref<16x16xf32, #tpu.memory_space<vmem>>, %arg3: memref<1x8x16x16xf32, #tpu.memory_space<vmem>>, %arg4: memref<1x16x8x16xf32, #tpu.memory_space<vmem>>, %arg5: memref<1x16x16x32xf32, #tpu.memory_space<vmem>>, %arg6: memref<1x8x16x32xf32, #tpu.memory_space<vmem>>, %arg7: memref<16x16x32xbf16, #tpu.memory_space<vmem>>) attributes {dimension_semantics = [#tpu.dimension_semantics<parallel>, #tpu.dimension_semantics<arbitrary>], iteration_bounds = array<i64: 2, 2>, scalar_prefetch = 0 : i64, scratch_operands = 1 : i64, tpu.core_type = #tpu.core_type<tc>, window_params = [{pipeline_mode = #tpu.pipeline_mode<synchronous>, transform_indices = @transform_0, window_bounds = array<i64: 16, 16>}, {transform_indices = @transform_1, window_bounds = array<i64: 1, 8, 16, 16>}, {transform_indices = @transform_2, window_bounds = array<i64: 1, 16, 8, 16>}, {transform_indices = @transform_3, window_bounds = array<i64: 1, 16, 16, 32>}, {transform_indices = @transform_4, window_bounds = array<i64: 1, 8, 16, 32>}]} {
    %c0_i32 = arith.constant 0 : i32
    %0 = arith.cmpi eq, %arg1, %c0_i32 : i32
    %1 = arith.extui %0 : i1 to i32
    %c0_i32_0 = arith.constant 0 : i32
    %2 = arith.cmpi ne, %1, %c0_i32_0 : i32
    scf.if %2 {
      %c0_26 = arith.constant 0 : index
      %c0_27 = arith.constant 0 : index
      %c0_28 = arith.constant 0 : index
      %c0_29 = arith.constant 0 : index
      %52 = vector.load %arg5[%c0_26, %c0_27, %c0_28, %c0_29] : memref<1x16x16x32xf32, #tpu.memory_space<vmem>>, vector<1x16x16x32xf32>
      %53 = vector.shape_cast %52 : vector<1x16x16x32xf32> to vector<16x16x32xf32>
      %54 = tpu.transpose %53, [1, 0, 2] : vector<16x16x32xf32> -> vector<16x16x32xf32>
      %55 = arith.truncf %54 : vector<16x16x32xf32> to vector<16x16x32xbf16>
      %c0_30 = arith.constant 0 : index
      %c0_31 = arith.constant 0 : index
      %c0_32 = arith.constant 0 : index
      %56 = vector.load %arg7[%c0_30, %c0_31, %c0_32] : memref<16x16x32xbf16, #tpu.memory_space<vmem>>, vector<16x16x32xbf16>
      tpu.vector_store %arg7[%c0_30, %c0_31, %c0_32], %55 {strides = array<i32>} : memref<16x16x32xbf16, #tpu.memory_space<vmem>>, vector<16x16x32xbf16>,
    } else {
    }
    %c8_i32 = arith.constant 8 : i32
    %3 = arith.muli %arg1, %c8_i32 : i32
    %4 = tpu.assume_multiple %3, 8 : i32
    %c0 = arith.constant 0 : index
    %c0_1 = arith.constant 0 : index
    %c0_2 = arith.constant 0 : index
    %c0_3 = arith.constant 0 : index
    %5 = vector.load %arg3[%c0, %c0_1, %c0_2, %c0_3] : memref<1x8x16x16xf32, #tpu.memory_space<vmem>>, vector<1x8x16x16xf32>
    %6 = vector.shape_cast %5 : vector<1x8x16x16xf32> to vector<8x16x16xf32>
    %c0_4 = arith.constant 0 : index
    %c0_5 = arith.constant 0 : index
    %7 = vector.load %arg2[%c0_4, %c0_5] : memref<16x16xf32, #tpu.memory_space<vmem>>, vector<16x16xf32>
    %8 = vector.shape_cast %7 : vector<16x16xf32> to vector<1x16x16xf32>
    %9 = vector.broadcast %8 : vector<1x16x16xf32> to vector<8x16x16xf32>
    %10 = arith.addf %6, %9 : vector<8x16x16xf32>
    %cst = arith.constant dense<0xFF800000> : vector<8x16xf32>
    %11 = vector.multi_reduction <maximumf>, %10, %cst [2] : vector<8x16x16xf32> to vector<8x16xf32>
    %12 = vector.shape_cast %11 : vector<8x16xf32> to vector<8x16x1xf32>
    %13 = vector.broadcast %12 : vector<8x16x1xf32> to vector<8x16x16xf32>
    %14 = arith.subf %10, %13 : vector<8x16x16xf32>
    %15 = math.exp %14 : vector<8x16x16xf32>
    %cst_6 = arith.constant dense<0.000000e+00> : vector<8x16xf32>
    %16 = vector.multi_reduction <add>, %15, %cst_6 [2] : vector<8x16x16xf32> to vector<8x16xf32>
    %17 = vector.shape_cast %16 : vector<8x16xf32> to vector<8x16x1xf32>
    %18 = arith.truncf %15 : vector<8x16x16xf32> to vector<8x16x16xbf16>
    %c0_7 = arith.constant 0 : index
    %c0_8 = arith.constant 0 : index
    %c0_9 = arith.constant 0 : index
    %c0_10 = arith.constant 0 : index
    %19 = vector.load %arg4[%c0_7, %c0_8, %c0_9, %c0_10] : memref<1x16x8x16xf32, #tpu.memory_space<vmem>>, vector<1x16x8x16xf32>
    %20 = vector.shape_cast %19 : vector<1x16x8x16xf32> to vector<16x8x16xf32>
    %21 = arith.index_cast %4 : i32 to index
    %c0_11 = arith.constant 0 : index
    %22 = vector.load %arg2[%21, %c0_11] : memref<16x16xf32, #tpu.memory_space<vmem>>, vector<8x16xf32>
    %23 = vector.shape_cast %22 : vector<8x16xf32> to vector<1x8x16xf32>
    %24 = vector.broadcast %23 : vector<1x8x16xf32> to vector<16x8x16xf32>
    %25 = arith.addf %20, %24 : vector<16x8x16xf32>
    %cst_12 = arith.constant dense<0xFF800000> : vector<16x8xf32>
    %26 = vector.multi_reduction <maximumf>, %25, %cst_12 [2] : vector<16x8x16xf32> to vector<16x8xf32>
    %27 = vector.shape_cast %26 : vector<16x8xf32> to vector<16x8x1xf32>
    %28 = vector.broadcast %27 : vector<16x8x1xf32> to vector<16x8x16xf32>
    %29 = arith.subf %25, %28 : vector<16x8x16xf32>
    %30 = math.exp %29 : vector<16x8x16xf32>
    %cst_13 = arith.constant dense<0.000000e+00> : vector<16x8xf32>
    %31 = vector.multi_reduction <add>, %30, %cst_13 [2] : vector<16x8x16xf32> to vector<16x8xf32>
    %32 = vector.shape_cast %31 : vector<16x8xf32> to vector<16x8x1xf32>
    %33 = arith.truncf %30 : vector<16x8x16xf32> to vector<16x8x16xbf16>
    %c0_14 = arith.constant 0 : index
    %34 = arith.index_cast %4 : i32 to index
    %c0_15 = arith.constant 0 : index
    %c0_16 = arith.constant 0 : index
    %35 = vector.load %arg5[%c0_14, %34, %c0_15, %c0_16] : memref<1x16x16x32xf32, #tpu.memory_space<vmem>>, vector<1x8x16x32xf32>
    %36 = vector.shape_cast %35 : vector<1x8x16x32xf32> to vector<8x16x32xf32>
    %37 = arith.truncf %36 : vector<8x16x32xf32> to vector<8x16x32xbf16>
    "tpu.trace_start"() <{level = 10 : i32, message = "rck,rkd->rcd"}> : () -> ()
    %cst_17 = arith.constant dense<0.000000e+00> : vector<8x16x32xf32>
    %38 = tpu.matmul %18, %37, %cst_17 {dimension_numbers = #tpu.dot_dimension_numbers<[2], [1], [1], [2], [0, 0, 0, 1, 1, 2], [0], [0]>} : vector<8x16x16xbf16>, vector<8x16x32xbf16>, vector<8x16x32xf32> -> vector<8x16x32xf32>
    "tpu.trace_stop"() : () -> ()
    %c0_18 = arith.constant 0 : index
    %c0_19 = arith.constant 0 : index
    %c0_20 = arith.constant 0 : index
    %39 = vector.load %arg7[%c0_18, %c0_19, %c0_20] : memref<16x16x32xbf16, #tpu.memory_space<vmem>>, vector<16x16x32xbf16>
    "tpu.trace_start"() <{level = 10 : i32, message = "crk,ckd->crd"}> : () -> ()
    %cst_21 = arith.constant dense<0.000000e+00> : vector<16x8x32xf32>
    %40 = tpu.matmul %33, %39, %cst_21 {dimension_numbers = #tpu.dot_dimension_numbers<[2], [1], [1], [2], [0, 0, 0, 1, 1, 2], [0], [0]>} : vector<16x8x16xbf16>, vector<16x16x32xbf16>, vector<16x8x32xf32> -> vector<16x8x32xf32>
    "tpu.trace_stop"() : () -> ()
    %41 = tpu.reciprocal %17 {approx = true} : vector<8x16x1xf32> -> vector<8x16x1xf32>
    %42 = vector.broadcast %41 : vector<8x16x1xf32> to vector<8x16x32xf32>
    %43 = arith.mulf %38, %42 : vector<8x16x32xf32>
    %44 = tpu.reciprocal %32 {approx = true} : vector<16x8x1xf32> -> vector<16x8x1xf32>
    %45 = vector.broadcast %44 : vector<16x8x1xf32> to vector<16x8x32xf32>
    %46 = arith.mulf %40, %45 : vector<16x8x32xf32>
    %47 = tpu.transpose %46, [1, 0, 2] : vector<16x8x32xf32> -> vector<8x16x32xf32>
    %48 = arith.addf %43, %47 : vector<8x16x32xf32>
    %c0_22 = arith.constant 0 : index
    %c0_23 = arith.constant 0 : index
    %c0_24 = arith.constant 0 : index
    %c0_25 = arith.constant 0 : index
    %49 = vector.load %arg6[%c0_22, %c0_23, %c0_24, %c0_25] : memref<1x8x16x32xf32, #tpu.memory_space<vmem>>, vector<1x8x16x32xf32>
    %50 = vector.shape_cast %49 : vector<1x8x16x32xf32> to vector<8x16x32xf32>
    %51 = vector.shape_cast %48 : vector<8x16x32xf32> to vector<1x8x16x32xf32>
    tpu.vector_store %arg6[%c0_22, %c0_23, %c0_24, %c0_25], %51 {strides = array<i32>} : memref<1x8x16x32xf32, #tpu.memory_space<vmem>>, vector<1x8x16x32xf32>,
    return
  }
  func.func @transform_0(%arg0: i32, %arg1: i32) -> (i32, i32) {
    %c0_i32 = arith.constant 0 : i32
    %c0_i32_0 = arith.constant 0 : i32
    %c0_i32_1 = arith.constant 0 : i32
    return %c0_i32, %c0_i32_0 : i32, i32
  }
  func.func @transform_1(%arg0: i32, %arg1: i32) -> (i32, i32, i32, i32) {
    %c0_i32 = arith.constant 0 : i32
    %c0_i32_0 = arith.constant 0 : i32
    %c0_i32_1 = arith.constant 0 : i32
    return %arg0, %arg1, %c0_i32, %c0_i32_0 : i32, i32, i32, i32
  }
  func.func @transform_2(%arg0: i32, %arg1: i32) -> (i32, i32, i32, i32) {
    %c0_i32 = arith.constant 0 : i32
    %c0_i32_0 = arith.constant 0 : i32
    %c0_i32_1 = arith.constant 0 : i32
    return %arg0, %c0_i32, %arg1, %c0_i32_0 : i32, i32, i32, i32
  }
  func.func @transform_3(%arg0: i32, %arg1: i32) -> (i32, i32, i32, i32) {
    %c0_i32 = arith.constant 0 : i32
    %c0_i32_0 = arith.constant 0 : i32
    %c0_i32_1 = arith.constant 0 : i32
    %c0_i32_2 = arith.constant 0 : i32
    return %arg0, %c0_i32, %c0_i32_0, %c0_i32_1 : i32, i32, i32, i32
  }
  func.func @transform_4(%arg0: i32, %arg1: i32) -> (i32, i32, i32, i32) {
    %c0_i32 = arith.constant 0 : i32
    %c0_i32_0 = arith.constant 0 : i32
    %c0_i32_1 = arith.constant 0 : i32
    return %arg0, %arg1, %c0_i32, %c0_i32_0 : i32, i32, i32, i32
  }
}

</mosaic_0001>

<bundles_post_ra>
// kernel: gaussian_trans.1
= control target key start
LH: loop header
LB: loop body
LE: loop exit
PB: predicated region body
PF: predicated region fallthrough
CT: control target
= control target key end

     0   :  { %s4969_s0 = inlined_call_operand.vmem [shape: f32[16,16], index: 0, kind: input, shape index: {}]   ;;  %s4970_s1 = inlined_call_operand.hbm [shape: f32[2,16,16,16], index: 1, kind: input, shape index: {}]   ;;  %s4971_s2 = inlined_call_operand.hbm [shape: f32[2,16,16,16], index: 2, kind: input, shape index: {}]   ;;  %s4972_s3 = inlined_call_operand.hbm [shape: f32[2,16,16,32], index: 3, kind: input, shape index: {}]   ;;  %s4973_s4 = inlined_call_operand.hbm [shape: f32[2,16,16,32], index: 4, kind: output, shape index: {}]  }
   0x1   :  { %4990 = sst [smem:[#allocation22_spill]] %s4969_s0 }
   0x2   :  { %4991 = sst [smem:[#allocation23_spill]] %s4971_s2 }
   0x3   :  { %4992 = sst [smem:[#allocation24_spill]] %s4973_s4 }
   0x4   :  { %9 = vsyncpa [#allocation4], 0 }
   0x5   :  { %11 = vsyncpa [#allocation4 + $0x1], 0 }
   0x6   :  { %12 = vsyncpa [#allocation7], 0 }
   0x7   :  { %14 = vsyncpa [#allocation7 + $0x1], 0 }
   0x8   :  { %15 = vsyncpa [#allocation5], 0 }
   0x9   :  { %17 = vsyncpa [#allocation5 + $0x1], 0  ;;  %s3683_s15 = smov 0   ;;  %s3685_s16 = smov 0  }
   0xa   :  { %s3687_s17 = smov 0   ;;  %s3689_s18 = smov 0  }
   0xb   :  { %s3691_s19 = smov 0   ;;  %s3693_s20 = smov 0  }
   0xc   :  { %s3695_s21 = smov 0   ;;  %s3697_s22 = smov 0  }
   0xd   :  { %s3699_s23 = smov 0   ;;  %s3701_s24 = smov 0  }
   0xe   :  { %s3703_s25 = smov 0  }
   0xf LB: > { %4993 = sst [smem:[#allocation14_spill]] %s3613_s18  ;;  %s3739_s26 = sadd.s32 4294967295, %s3641_s25   ;;  %s3641_s25 = sphi %s3703_s25, %s23_s25   ;;  %s3637_s24 = sphi %s3701_s24, %s5039_s24   ;;  %s3633_s23 = sphi %s3699_s23, %s5038_s23   ;;  %s3629_s22 = sphi %s3697_s22, %s5037_s22   ;;  %s3625_s21 = sphi %s3695_s21, %s5036_s21   ;;  %s3621_s20 = sphi %s3693_s20, %s5035_s20   ;;  %s3617_s19 = sphi %s3691_s19, %s5034_s19   ;;  %s3613_s18 = sphi %s3689_s18, %s5033_s18   ;;  %s3609_s17 = sphi %s3687_s17, %s5032_s17   ;;  %s3605_s16 = sphi %s3685_s16, %s5031_s16   ;;  %s3601_s15 = sphi %s3683_s15, %s5030_s15  }
  0x10   : > { %4994 = sst [smem:[#allocation15_spill]] %s3625_s21  ;;  %s2921_s27 = sadd.s32 4294967294, %s3641_s25  }
  0x11   : > { %4995 = sst [smem:[#allocation16_spill]] %s3629_s22  ;;  %s32_s28 = sadd.s32 1, %s3633_s23 }
  0x12   : > { %s35_s29 = sadd.s32 1, %s3637_s24  ;;  %p33_p0 = scmp.ge.s32.totalorder %s32_s28, 2 }
  0x13   : > { %s65_s30 = sadd.s32 1, %s3621_s20  ;;  %p72_p1 = scmp.ne.s32.totalorder %s3621_s20, %s3617_s19 }
  0x14   : > { %p4983_p2 = scmp.eq.s32.totalorder %s3641_s25, 0  ;;  %s5041_s28 = smov (%p33_p0, %s32_s28), 0 }
  0x15   : > { %4996 = sst [smem:[#allocation17_spill]] %s5041_s28  ;;  %s5043_s29 = smov (!%p33_p0, %s35_s29), %s3637_s24 }
  0x16   : > { %s61_s5 = ssub.s32 %s3633_s23, %s5041_s28  ;;  %p3755_p3 = por %p4983_p2, %p72_p1 }
  0x17   : > { %p37_p4 = scmp.ge.s32.totalorder %s5043_s29, 2  ;;  %p78_p5 = scmp.ne.s32.totalorder %s3617_s19, %s3613_s18 }
  0x18   : > { %p4982_p6 = scmp.eq.s32.totalorder %s3739_s26, 0  ;;  %p158_p7 = scmp.eq.s32.totalorder %s3739_s26, 3 }
  0x19   : > { %s5045_s29 = smov (%p37_p4, %s5043_s29), 0  ;;  %p164_p10 = scmp.eq.s32.totalorder %s2921_s27, 3 }
  0x1a   : > { %4998 = sst [smem:[#allocation18_spill]] %s5045_s29  ;;  %p3767_p8 = por %p4982_p6, %p78_p5 }
  0x1b   : > { %p3771_p9 = por %p158_p7, %p72_p1  ;;  %s3777_s9 = ssub.s32 %s3637_s24, %s5045_s29 }
  0x1c   : > { %s4999_s7 = scalar_select %p3767_p8, 1, 0 }
  0x1d   : > { %s5000_s8 = scalar_select %p3771_p9, 1, 0 }
  0x1e   : > { %s62_s10 = sor.u32 %s61_s5, %s3777_s9  ;;  %p3781_p13 = por %p164_p10, %p78_p5 }
  0x1f   : > { %5001 = sst [smem:[#allocation19_spill]] %s5000_s8  ;;  %p63_p12 = scmp.eq.s32.totalorder %s62_s10, 0 }
  0x20   : > { %s5002_s11 = scalar_select %p3781_p13, 1, 0 }
  0x21   : > { %p4981_p0 = scmp.lt.s32.totalorder %s3641_s25, 4  ;;  %s4977_s13 = sand.u32 1, %s3621_s20  }
  0x22   : > { %5003 = sst [smem:[#allocation20_spill]] %s5002_s11  ;;  %s2927_s14 = sshll.u32 %s3637_s24, 5 }
  0x23   : > { %s3787_s12 = scalar_select %p63_p12, %s3621_s20, %s65_s30  }
  0x24   : > { %s3793_s28 = sshll.u32 %s4977_s13, 7  ;;  %p3799_p1 = pnand %p4981_p0, %p3755_p3 }
  0x25   : > { %5004 = sst [smem:[#allocation21_spill]] %s3787_s12  ;;  %s211_s5 = sand.u32 1, %s3641_s25  }
  0x26   : > { %s220_s10 = sadd.s32 %s3633_s23, %s2927_s14  ;;  %s215_s29 = scalar_lea.vmem [#allocation6], %s3793_s28 }
  0x27   : > { %s223_s30 = sshll.u32 %s215_s29, 4  ;;  %s2931_s12 = sshll.u32 %s220_s10, 7  ;;  %s3808_s30 = int_to_ptr.vmem [resolvable:$true] %s223_s30 }
  0x28   : > { %s5006_s2 = sld [smem:[#allocation23_spill]]  ;;  %s3815_s18 = scalar_lea.sflag [#allocation7], %s211_s5 }
  0x29   : > { %p3423_p4 = pneg %p3799_p1 }
  0x2e   : > { %s3813_s6 = scalar_lea.hbm %s5006_s2, %s2931_s12  ;;  %s3426_s11 = scalar_lea.hbm %s5006_s2, 8192 }
  0x2f   : > { %s3421_s8 = scalar_lea.hbm %s3813_s6, 2048  ;;  %p3427_p10 = scmp.lt.u32.totalorder %s3813_s6, %s5006_s2 }
  0x30   : > { %p3422_p3 = scmp.ne.s32.totalorder %s3813_s6, %s3421_s8  ;;  %p3428_p12 = scmp.lt.u32.totalorder %s3426_s11, %s3421_s8 }
  0x31   : > { %p3430_p6 = scmp.lt.u32.totalorder %s3421_s8, %s3813_s6 }
  0x32   : > { %p3424_p5 = pnand %p3423_p4, %p3422_p3  ;;  %p3429_p0 = por %p3428_p12, %p3427_p10 }
  0x34   : > { %p3425_p7 = pneg %p3424_p5  ;;  %p3431_p2 = por %p3430_p6, %p3429_p0 }
  0x36   : > { %p3432_p11 = pnand %p3431_p2, %p3425_p7 }
  0x38   : > { %3435 = shalt.err (!%p3432_p11)
}
  0x39   : > { %s3436_s5 = scalar_lea.vmem %s3808_s30, 2048  ;;  %s3643_s29 = smov [#allocation6]  }
  0x3a   : > { %p3437_p3 = scmp.ne.s32.totalorder %s3808_s30, %s3436_s5  ;;  %s3441_s10 = sshll.u32 %s3643_s29, 4  ;;  %s3442_s10 = int_to_ptr.vmem [resolvable:$false] %s3441_s10 }
  0x3b   : > { %s3443_s12 = scalar_lea.vmem %s3442_s10, 4096  ;;  %p3444_p9 = scmp.lt.s32.totalorder %s3808_s30, %s3442_s10 }
  0x3c   : > { %p3439_p5 = pnand %p3437_p3, %p3423_p4  ;;  %p3445_p10 = scmp.lt.s32.totalorder %s3443_s12, %s3436_s5 }
  0x3e   : > { %p3440_p13 = pneg %p3439_p5  ;;  %p3446_p12 = por %p3445_p10, %p3444_p9 }
  0x40   : > { %p3447_p6 = pnand %p3446_p12, %p3440_p13 }
  0x42   : > { %3450 = shalt.err (!%p3447_p6)
}
  0x43   : > { %s3644_s8 = smov 256   ;;  %s3645_s11 = smov 128  }
  0x44   : > { %s3646_s13 = smov 8   ;;  %p2935_p2 = scmp.ge.s32.totalorder %s3641_s25, 1 }
  0x45   : > { %3184 = dma.hbm_to_vmem [thread:$0]  (!%p3799_p1), %s3813_s6, 2048, %s3808_s30, %s3815_s18, %s3644_s8, %s3645_s11, %s3646_s13  }
  0x46   : > { %p252_p9 = scmp.lt.s32.totalorder %s3641_s25, 5  ;;  %s2974_s29 = sshll.u32 %s3633_s23, 4 }
  0x47   : > { %s198_s10 = sadd.s32 %s2974_s29, %s2927_s14  ;;  %s191_s12 = scalar_lea.vmem [#allocation3], %s3793_s28 }
  0x48   : > { %p3847_p11 = pnand %p2935_p2, %p252_p9  ;;  %s201_s2 = sshll.u32 %s191_s12, 4  ;;  %s3855_s2 = int_to_ptr.vmem [resolvable:$true] %s201_s2 }
  0x49   : > { %s2928_s4 = sshll.u32 %s198_s10, 7  ;;  %s5008_s30 = sand.u32 1, %s3621_s20  }
  0x4a   : > { %s3860_s21 = scalar_lea.hbm %s4970_s1, %s2928_s4  ;;  %s3864_s6 = scalar_lea.sflag [#allocation4], %s5008_s30 }
  0x4b   : > { %s3451_s8 = scalar_lea.hbm %s3860_s21, 2048  ;;  %s3456_s29 = scalar_lea.hbm %s4970_s1, 8192 }
  0x4c   : > { %p3452_p13 = scmp.ne.s32.totalorder %s3860_s21, %s3451_s8  ;;  %p3457_p3 = scmp.lt.u32.totalorder %s3860_s21, %s4970_s1 }
  0x4d   : > { %p3458_p5 = scmp.lt.u32.totalorder %s3456_s29, %s3451_s8  ;;  %p3460_p12 = scmp.lt.u32.totalorder %s3451_s8, %s3860_s21 }
  0x4e   : > { %p3454_p0 = pnand %p3452_p13, %p3423_p4 }
  0x4f   : > { %p3459_p10 = por %p3458_p5, %p3457_p3 }
  0x50   : > { %p3455_p7 = pneg %p3454_p0 }
  0x51   : > { %p3461_p6 = por %p3460_p12, %p3459_p10 }
  0x53   : > { %p3462_p2 = pnand %p3461_p6, %p3455_p7 }
  0x55   : > { %3465 = shalt.err (!%p3462_p2)
}
  0x56   : > { %s3466_s22 = scalar_lea.vmem %s3855_s2, 2048  ;;  %s3647_s10 = smov [#allocation3]  }
  0x57   : > { %p3467_p9 = scmp.ne.s32.totalorder %s3855_s2, %s3466_s22  ;;  %s3471_s12 = sshll.u32 %s3647_s10, 4  ;;  %s3472_s12 = int_to_ptr.vmem [resolvable:$false] %s3471_s12 }
  0x58   : > { %s3473_s30 = scalar_lea.vmem %s3472_s12, 4096  ;;  %p3474_p8 = scmp.lt.s32.totalorder %s3855_s2, %s3472_s12 }
  0x59   : > { %p3469_p13 = pnand %p3467_p9, %p3423_p4  ;;  %p3475_p3 = scmp.lt.s32.totalorder %s3473_s30, %s3466_s22 }
  0x5b   : > { %p3470_p0 = pneg %p3469_p13  ;;  %p3476_p5 = por %p3475_p3, %p3474_p8 }
  0x5d   : > { %p3477_p10 = pnand %p3476_p5, %p3470_p0 }
  0x5f   : > { %3480 = shalt.err (!%p3477_p10)
}
  0x60   : > { %3181 = dma.hbm_to_vmem [thread:$0]  (!%p3799_p1), %s3860_s21, 2048, %s3855_s2, %s3864_s6, %s3645_s11, %s3645_s11, %s3646_s13  }
  0x61   : > { %s119_s27 = sadd.s32 1, %s3609_s17  ;;  %p5009_p8 = scmp.eq.s32.totalorder %s3777_s9, 0 }
  0x62   : > { %p126_p4 = scmp.ne.s32.totalorder %s3609_s17, %s3605_s16  ;;  %p132_p7 = scmp.ne.s32.totalorder %s3605_s16, %s3601_s15 }
  0x63   : > { %s3897_s8 = scalar_select %p5009_p8, %s3609_s17, %s119_s27  }
  0x64   : > { %s235_s28 = sand.u32 1, %s3609_s17   ;;  %s2975_s14 = sshll.u32 %s3637_s24, 12 }
  0x65   : > { %p5010_p12 = scmp.eq.s32.totalorder %s3641_s25, 0  ;;  %p5011_p2 = scmp.eq.s32.totalorder %s3739_s26, 0 }
  0x66   : > { %s2932_s0 = sshll.u32 %s235_s28, 8  ;;  %s3916_s2 = scalar_lea.hbm %s4972_s3, %s2975_s14 }
  0x67   : > { %p128_p6 = por %p126_p4, %p5010_p12  ;;  %p3909_p9 = por %p132_p7, %p5011_p2 }
  0x68   : > { %p5013_p1 = scmp.lt.s32.totalorder %s3641_s25, 4  ;;  %s237_s21 = scalar_lea.vmem [#allocation8], %s2932_s0 }
  0x69   : > { %s5012_s29 = scalar_select %p3909_p9, 1, 0 }
  0x6a   : > { %p3920_p13 = pnand %p5013_p1, %p128_p6  ;;  %s244_s9 = sshll.u32 %s237_s21, 4  ;;  %s3924_s9 = int_to_ptr.vmem [resolvable:$true] %s244_s9 }
  0x6b   : > { %s3481_s6 = scalar_lea.hbm %s3916_s2, 4096  ;;  %s3486_s30 = scalar_lea.hbm %s4972_s3, 8192 }
  0x6c   : > { %p3482_p0 = scmp.ne.s32.totalorder %s3916_s2, %s3481_s6  ;;  %p3483_p3 = pneg %p3920_p13 }
  0x6d   : > { %p3487_p8 = scmp.lt.u32.totalorder %s3916_s2, %s4972_s3  ;;  %p3488_p4 = scmp.lt.u32.totalorder %s3486_s30, %s3481_s6 }
  0x6e   : > { %p3484_p5 = pnand %p3483_p3, %p3482_p0  ;;  %p3490_p12 = scmp.lt.u32.totalorder %s3481_s6, %s3916_s2 }
  0x6f   : > { %p3489_p7 = por %p3488_p4, %p3487_p8 }
  0x70   : > { %p3485_p10 = pneg %p3484_p5 }
  0x71   : > { %p3491_p6 = por %p3490_p12, %p3489_p7 }
  0x73   : > { %p3492_p2 = pnand %p3491_p6, %p3485_p10 }
  0x75   : > { %3495 = shalt.err (!%p3492_p2)
}
  0x76   : > { %s3496_s14 = scalar_lea.vmem %s3924_s9, 4096  ;;  %s3648_s0 = smov [#allocation8]  }
  0x77   : > { %p3497_p1 = scmp.ne.s32.totalorder %s3924_s9, %s3496_s14  ;;  %s3501_s4 = sshll.u32 %s3648_s0, 4  ;;  %s3502_s4 = int_to_ptr.vmem [resolvable:$false] %s3501_s4 }
  0x78   : > { %s3503_s22 = scalar_lea.vmem %s3502_s4, 8192  ;;  %p3504_p9 = scmp.lt.s32.totalorder %s3924_s9, %s3502_s4 }
  0x79   : > { %p3499_p0 = pnand %p3497_p1, %p3483_p3  ;;  %p3505_p8 = scmp.lt.s32.totalorder %s3503_s22, %s3496_s14 }
  0x7b   : > { %p3500_p5 = pneg %p3499_p0  ;;  %p3506_p4 = por %p3505_p8, %p3504_p9 }
  0x7d   : > { %p3507_p7 = pnand %p3506_p4, %p3500_p5 }
  0x7f   : > { %3510 = shalt.err (!%p3507_p7)
}
  0x80   : > { %3187 = dma.hbm_to_vmem [thread:$0]  (!%p3920_p13), %s3916_s2, 4096, %s3924_s9, %s3815_s18, %s3645_s11, %s3645_s11, %s3646_s13  }
  0x81   : > { %256 = sbr.rel (%p3847_p11) target bundleno = 713 (0x2c9), region = 36  ;;  %s3958_s21 = sand.u32 (!%p3847_p11), 1, %s3617_s19  }
  0x82   : > { %s2936_s6 = sshll.u32 (!%p3847_p11), %s3958_s21, 7  ;;  %s259_s10 = scalar_lea.sflag (!%p3847_p11), [#allocation4], %s3958_s21 }
  0x83   : > { %s3962_s12 = scalar_lea.vmem (!%p3847_p11), [#allocation3], %s2936_s6  ;;  %p5015_p9 = scmp.ne.s32.totalorder (!%p3847_p11), %s4999_s7, 0 }
  0x88   : > { %3584 = dma.done.wait (%p5015_p9), %s259_s10, 2048  }
  0x89   : > { %3586 = vsyncadd (%p5015_p9), %s259_s10, 4294965248  ;;  %s267_s18 = sand.u32 1, %s3739_s26   ;;  %s3969_s13 = scalar_lea.vmem [#allocation6], %s2936_s6 }
  0x8a   : > { %s268_s11 = scalar_lea.sflag [#allocation7], %s267_s18 }
  0x8b   : > { %3588 = dma.done.wait (%p5015_p9), %s268_s11, 2048  }
  0x8c   : > { %3590 = vsyncadd (%p5015_p9), %s268_s11, 4294965248  ;;  %s278_s5 = sand.u32 1, %s3605_s16   ;;  %p5016_p11 = scmp.ne.s32.totalorder %s5012_s29, 0 }
  0x8d   : > { %s2938_s2 = sshll.u32 %s278_s5, 8 }
  0x8e   : > { %s3976_s15 = scalar_lea.vmem [#allocation8], %s2938_s2 }
  0x8f   : > { %3592 = dma.done.wait (%p5016_p11), %s268_s11, 4096  }
  0x90   : > { %3594 = vsyncadd (%p5016_p11), %s268_s11, 4294963200  ;;  %s3982_s26 = scalar_lea.vmem [#allocation9], %s2936_s6  ;;  %s5017_s9 = sld [smem:[#allocation15_spill]] }
  0x96   : > { %p2940_p13 = scmp.ne.s32.totalorder %s5017_s9, 0 }
  0x97   : > { %v3986_v0 = vld [vmem:[%s3976_s15] sm:$0xff] (!%p2940_p13)  ;;  %v3989_v1 = vld [vmem:[%s3976_s15 + $0x10] sm:$0xff] (!%p2940_p13)  ;;  %v359_v3 = vlaneseq (!%p2940_p13)  ;;  %v3649_v8 = vmov (!%p2940_p13), 1983009808   ;;  %v3650_v16 = vmov (!%p2940_p13), 1934713408  }
  0x98   : > { %321 = sbr.rel (%p2940_p13) target bundleno = 207 (0xcf), region = 52  ;;  %v3992_v2 = vld [vmem:[%s3976_s15 + $0x20] sm:$0xff] (!%p2940_p13)  ;;  %v3995_v4 = vld [vmem:[%s3976_s15 + $0x30] sm:$0xff] (!%p2940_p13)  ;;  %v357_v9 = vunpack.c.l.s4 (!%p2940_p13), %v3649_v8  ;;  %v421_v17 = vunpack.c.l.s4 (!%p2940_p13), %v3650_v16  ;;  %vm914_vm0 = vcmask (!%p2940_p13), 261120  }
  0x99   : > { %v3998_v5 = vld [vmem:[%s3976_s15 + $0x40] sm:$0xff] (!%p2940_p13)  ;;  %v4001_v6 = vld [vmem:[%s3976_s15 + $0x50] sm:$0xff] (!%p2940_p13)  ;;  %v354_v7 = vcombine.low (!%p2940_p13), %v3986_v0, %v3992_v2  ;;  %v355_v10 = vcombine.high (!%p2940_p13), %v3986_v0, %v3992_v2  ;;  %v360_v14 = vshrl.u32 (!%p2940_p13), %v359_v3, 7  ;;  %v370_v15 = vcombine.low (!%p2940_p13), %v3989_v1, %v3995_v4 }
  0x9a   : > { %v4008_v11 = vld [vmem:[%s3976_s15 + $0x60] sm:$0xff] (!%p2940_p13)  ;;  %v4011_v12 = vld [vmem:[%s3976_s15 + $0x70] sm:$0xff] (!%p2940_p13)  ;;  %v371_v18 = vcombine.high (!%p2940_p13), %v3989_v1, %v3995_v4  ;;  %v358_v22 = vunpack.c.0.s8 (!%p2940_p13), %v357_v9  ;;  %v422_v29 = vunpack.c.0.s8 (!%p2940_p13), %v421_v17 }
  0x9b   : > { %v4014_v13 = vld [vmem:[%s3976_s15 + $0x80] sm:$0xff] (!%p2940_p13)  ;;  %v4021_v19 = vld [vmem:[%s3976_s15 + $0x90] sm:$0xff] (!%p2940_p13)  ;;  %v386_v23 = vcombine.low (!%p2940_p13), %v3998_v5, %v4008_v11  ;;  %v402_v24 = vcombine.low (!%p2940_p13), %v4001_v6, %v4011_v12  ;;  %v387_v25 = vcombine.high (!%p2940_p13), %v3998_v5, %v4008_v11  ;;  %v403_v32 = vcombine.high (!%p2940_p13), %v4001_v6, %v4011_v12 }
  0x9c   : > { %v4024_v20 = vld [vmem:[%s3976_s15 + $0xa0] sm:$0xff] (!%p2940_p13)  ;;  %v4027_v21 = vld [vmem:[%s3976_s15 + $0xb0] sm:$0xff] (!%p2940_p13)  ;;  %v4051_v34 = vsub.s32 (!%p2940_p13), %v358_v22, %v360_v14  ;;  %v4059_v38 = vsub.s32 (!%p2940_p13), %v422_v29, %v360_v14 }
  0x9d   : > { %v4036_v26 = vld [vmem:[%s3976_s15 + $0xc0] sm:$0xff] (!%p2940_p13)  ;;  %v4039_v27 = vld [vmem:[%s3976_s15 + $0xd0] sm:$0xff] (!%p2940_p13)  ;;  %v490_v30 = vcombine.low (!%p2940_p13), %v4014_v13, %v4024_v20  ;;  %v506_v31 = vcombine.low (!%p2940_p13), %v4021_v19, %v4027_v21  ;;  %v491_v36 = vcombine.high (!%p2940_p13), %v4014_v13, %v4024_v20  ;;  %v507_v37 = vcombine.high (!%p2940_p13), %v4021_v19, %v4027_v21 }
  0x9e   : > { %v4042_v28 = vld [vmem:[%s3976_s15 + $0xe0] sm:$0xff] (!%p2940_p13)  ;;  %v352_v33 = vld [vmem:[%s3976_s15 + $0xf0] sm:$0xff] (!%p2940_p13)  ;;  %v362_v42 = vrot.slane (!%p2940_p13), %v354_v7, %v4051_v34  ;;  %v378_v43 = vrot.slane (!%p2940_p13), %v370_v15, %v4051_v34  ;;  %v394_v44 = vrot.slane (!%p2940_p13), %v386_v23, %v4051_v34  ;;  %v410_v45 = vrot.slane (!%p2940_p13), %v402_v24, %v4051_v34 }
  0x9f   : > { %v522_v35 = vcombine.low %v4036_v26, %v4042_v28  ;;  %v538_v39 = vcombine.low %v4039_v27, %v352_v33  ;;  %v523_v40 = vcombine.high %v4036_v26, %v4042_v28  ;;  %v539_v41 = vcombine.high %v4039_v27, %v352_v33  ;;  %v4097_v26 = vld [vmem:[%s3976_s15 + $0x8] sm:$0xff]  ;;  %v4100_v27 = vld [vmem:[%s3976_s15 + $0x18] sm:$0xff] }
  0xa0   : > { %v498_v46 = vrot.slane %v490_v30, %v4051_v34  ;;  %v514_v47 = vrot.slane %v506_v31, %v4051_v34  ;;  %v418_v50 = vcombine.low %v362_v42, %v378_v43  ;;  %v450_v51 = vcombine.low %v394_v44, %v410_v45  ;;  %v4108_v33 = vld [vmem:[%s3976_s15 + $0x38] sm:$0xff] }
  0xa1   : > { %v530_v48 = vrot.slane %v522_v35, %v4051_v34  ;;  %v546_v49 = vrot.slane %v538_v39, %v4051_v34  ;;  %v419_v52 = vcombine.high %v362_v42, %v378_v43  ;;  %v451_v53 = vcombine.high %v394_v44, %v410_v45  ;;  %v4111_v35 = vld [vmem:[%s3976_s15 + $0x48] sm:$0xff]  ;;  %v4122_v43 = vld [vmem:[%s3976_s15 + $0x78] sm:$0xff] }
  0xa2   : > { %v554_v54 = vcombine.low %v498_v46, %v514_v47  ;;  %v555_v56 = vcombine.high %v498_v46, %v514_v47  ;;  %v426_v58 = vrot.slane %v418_v50, %v4059_v38  ;;  %v458_v59 = vrot.slane %v450_v51, %v4059_v38  ;;  %v4119_v42 = vld [vmem:[%s3976_s15 + $0x68] sm:$0xff] }
  0xa3   : > { %v586_v55 = vcombine.low %v530_v48, %v546_v49  ;;  %v587_v57 = vcombine.high %v530_v48, %v546_v49  ;;  %v433_v60 = vrot.slane %v419_v52, %v4059_v38  ;;  %v465_v61 = vrot.slane %v451_v53, %v4059_v38  ;;  %v4129_v52 = vld [vmem:[%s3976_s15 + $0x88] sm:$0xff]  ;;  %v4132_v53 = vld [vmem:[%s3976_s15 + $0x98] sm:$0xff] }
  0xa4   : > { %v562_v62 = vrot.slane %v554_v54, %v4059_v38  ;;  %v569_v1 = vrot.slane %v555_v56, %v4059_v38  ;;  %v482_v4 = vcombine.low %v426_v58, %v458_v59  ;;  %v483_v5 = vcombine.high %v426_v58, %v458_v59 }
  0xa5   : > { %v594_v63 = vrot.slane %v586_v55, %v4059_v38  ;;  %v601_v3 = vrot.slane %v587_v57, %v4059_v38  ;;  %v484_v6 = vcombine.low %v433_v60, %v465_v61  ;;  %v485_v7 = vcombine.high %v433_v60, %v465_v61 }
  0xa6   : > { %v369_v13 = vrot.slane %v355_v10, %v4051_v34  ;;  %v385_v14 = vrot.slane %v371_v18, %v4051_v34  ;;  %v401_v15 = vrot.slane %v387_v25, %v4051_v34  ;;  %v417_v16 = vrot.slane %v403_v32, %v4051_v34  ;;  %v4105_v32 = vld [vmem:[%s3976_s15 + $0x28] sm:$0xff] }
  0xa7   : > { %v618_v8 = vcombine.low %v562_v62, %v594_v63  ;;  %v619_v9 = vcombine.high %v562_v62, %v594_v63  ;;  %v620_v11 = vcombine.low %v569_v1, %v601_v3  ;;  %v621_v12 = vcombine.high %v569_v1, %v601_v3  ;;  %v343_v62 = vld [vmem:[%s3976_s15 + $0xa8] sm:$0xff]  ;;  %v4144_v63 = vld [vmem:[%s3976_s15 + $0xb8] sm:$0xff] }
  0xa8   : > { %v434_v22 = vcombine.low %v369_v13, %v385_v14  ;;  %v466_v23 = vcombine.low %v401_v15, %v417_v16  ;;  %v505_v24 = vrot.slane %v491_v36, %v4051_v34  ;;  %v521_v0 = vrot.slane %v507_v37, %v4051_v34  ;;  %v4147_v1 = vld [vmem:[%s3976_s15 + $0xc8] sm:$0xff]  ;;  %v4150_v3 = vld [vmem:[%s3976_s15 + $0xd8] sm:$0xff] }
  0xa9   : > { %v898_v17 = vpack.c.bf16 %v618_v8, %v482_v4  ;;  %v899_v19 = vpack.c.bf16 %v619_v9, %v483_v5  ;;  %v900_v20 = vpack.c.bf16 %v620_v11, %v484_v6  ;;  %v901_v21 = vpack.c.bf16 %v621_v12, %v485_v7  ;;  %v4153_v4 = vld [vmem:[%s3976_s15 + $0xe8] sm:$0xff]  ;;  %v4156_v5 = vld [vmem:[%s3976_s15 + $0xf8] sm:$0xff] }
  0xaa   : > { %v537_v2 = vrot.slane %v523_v40, %v4051_v34  ;;  %v553_v10 = vrot.slane %v539_v41, %v4051_v34  ;;  %v435_v18 = vcombine.high %v369_v13, %v385_v14  ;;  %v467_v25 = vcombine.high %v401_v15, %v417_v16  ;;  %v4116_v41 = vld [vmem:[%s3976_s15 + $0x58] sm:$0xff] }
  0xab   : > { %915 = vst.msk [vmem:[#allocation2] sm:$0xff] %vm914_vm0, %v898_v17  ;;  %916 = vst.msk [vmem:[#allocation2 + $0x8] sm:$0xff] %vm914_vm0, %v899_v19  ;;  %v442_v28 = vrot.slane %v434_v22, %v4059_v38  ;;  %v474_v29 = vrot.slane %v466_v23, %v4059_v38  ;;  %v570_v30 = vcombine.low %v505_v24, %v521_v0 }
  0xac   : > { %917 = vst.msk [vmem:[#allocation2 + $0x10] sm:$0xff] %vm914_vm0, %v900_v20  ;;  %918 = vst.msk [vmem:[#allocation2 + $0x18] sm:$0xff] %vm914_vm0, %v901_v21  ;;  %v571_v31 = vcombine.high %v505_v24, %v521_v0  ;;  %v602_v36 = vcombine.low %v537_v2, %v553_v10  ;;  %v449_v37 = vrot.slane %v435_v18, %v4059_v38 }
  0xad   : > { %v481_v39 = vrot.slane %v467_v25, %v4059_v38  ;;  %v603_v40 = vcombine.high %v537_v2, %v553_v10  ;;  %v486_v44 = vcombine.low %v442_v28, %v474_v29  ;;  %v578_v45 = vrot.slane %v570_v30, %v4059_v38 }
  0xae   : > { %v487_v46 = vcombine.high %v442_v28, %v474_v29  ;;  %v585_v47 = vrot.slane %v571_v31, %v4059_v38  ;;  %v610_v48 = vrot.slane %v602_v36, %v4059_v38  ;;  %v626_v54 = vcombine.low %v4097_v26, %v4105_v32 }
  0xaf   : > { %v488_v49 = vcombine.low %v449_v37, %v481_v39  ;;  %v617_v50 = vrot.slane %v603_v40, %v4059_v38  ;;  %v489_v51 = vcombine.high %v449_v37, %v481_v39  ;;  %v642_v55 = vcombine.low %v4100_v27, %v4108_v33 }
  0xb0   : > { %v658_v56 = vcombine.low %v4111_v35, %v4119_v42  ;;  %v674_v57 = vcombine.low %v4116_v41, %v4122_v43  ;;  %v622_v58 = vcombine.low %v578_v45, %v610_v48  ;;  %v623_v59 = vcombine.high %v578_v45, %v610_v48 }
  0xb1   : > { %v624_v60 = vcombine.low %v585_v47, %v617_v50  ;;  %v625_v61 = vcombine.high %v585_v47, %v617_v50  ;;  %v634_v6 = vrot.slane %v626_v54, %v4051_v34  ;;  %v650_v7 = vrot.slane %v642_v55, %v4051_v34 }
  0xb2   : > { %v666_v8 = vrot.slane %v658_v56, %v4051_v34  ;;  %v682_v9 = vrot.slane %v674_v57, %v4051_v34  ;;  %v902_v11 = vpack.c.bf16 %v622_v58, %v486_v44  ;;  %v903_v12 = vpack.c.bf16 %v623_v59, %v487_v46 }
  0xb3   : > { %v904_v13 = vpack.c.bf16 %v624_v60, %v488_v49  ;;  %v905_v14 = vpack.c.bf16 %v625_v61, %v489_v51  ;;  %v690_v15 = vcombine.low %v634_v6, %v650_v7  ;;  %v762_v17 = vcombine.low %v4129_v52, %v343_v62 }
  0xb4   : > { %v722_v16 = vcombine.low %v666_v8, %v682_v9  ;;  %v778_v19 = vcombine.low %v4132_v53, %v4144_v63  ;;  %919 = vst.msk [vmem:[#allocation2 + $0x20] sm:$0xff] %vm914_vm0, %v902_v11  ;;  %920 = vst.msk [vmem:[#allocation2 + $0x28] sm:$0xff] %vm914_vm0, %v903_v12  ;;  %v794_v20 = vcombine.low %v4147_v1, %v4153_v4 }
  0xb5   : > { %921 = vst.msk [vmem:[#allocation2 + $0x30] sm:$0xff] %vm914_vm0, %v904_v13  ;;  %922 = vst.msk [vmem:[#allocation2 + $0x38] sm:$0xff] %vm914_vm0, %v905_v14  ;;  %v810_v21 = vcombine.low %v4150_v3, %v4156_v5  ;;  %v691_v22 = vcombine.high %v634_v6, %v650_v7  ;;  %v723_v23 = vcombine.high %v666_v8, %v682_v9 }
  0xb6   : > { %v698_v24 = vrot.slane %v690_v15, %v4059_v38  ;;  %v730_v0 = vrot.slane %v722_v16, %v4059_v38  ;;  %v770_v2 = vrot.slane %v762_v17, %v4051_v34  ;;  %v786_v10 = vrot.slane %v778_v19, %v4051_v34 }
  0xb7   : > { %v802_v18 = vrot.slane %v794_v20, %v4051_v34  ;;  %v818_v25 = vrot.slane %v810_v21, %v4051_v34  ;;  %v705_v28 = vrot.slane %v691_v22, %v4059_v38  ;;  %v737_v29 = vrot.slane %v723_v23, %v4059_v38 }
  0xb8   : > { %v754_v30 = vcombine.low %v698_v24, %v730_v0  ;;  %v826_v31 = vcombine.low %v770_v2, %v786_v10  ;;  %v755_v36 = vcombine.high %v698_v24, %v730_v0  ;;  %v827_v37 = vcombine.high %v770_v2, %v786_v10 }
  0xb9   : > { %v858_v39 = vcombine.low %v802_v18, %v818_v25  ;;  %v756_v40 = vcombine.low %v705_v28, %v737_v29  ;;  %v859_v44 = vcombine.high %v802_v18, %v818_v25  ;;  %v757_v45 = vcombine.high %v705_v28, %v737_v29 }
  0xba   : > { %v834_v46 = vrot.slane %v826_v31, %v4059_v38  ;;  %v841_v47 = vrot.slane %v827_v37, %v4059_v38  ;;  %v627_v48 = vcombine.high %v4097_v26, %v4105_v32  ;;  %v643_v49 = vcombine.high %v4100_v27, %v4108_v33 }
  0xbb   : > { %v866_v50 = vrot.slane %v858_v39, %v4059_v38  ;;  %v873_v51 = vrot.slane %v859_v44, %v4059_v38  ;;  %v659_v54 = vcombine.high %v4111_v35, %v4119_v42  ;;  %v675_v55 = vcombine.high %v4116_v41, %v4122_v43 }
  0xbc   : > { %v641_v56 = vrot.slane %v627_v48, %v4051_v34  ;;  %v657_v57 = vrot.slane %v643_v49, %v4051_v34  ;;  %v763_v58 = vcombine.high %v4129_v52, %v343_v62  ;;  %v779_v26 = vcombine.high %v4132_v53, %v4144_v63 }
  0xbd   : > { %v890_v27 = vcombine.low %v834_v46, %v866_v50  ;;  %v891_v32 = vcombine.high %v834_v46, %v866_v50  ;;  %v892_v33 = vcombine.low %v841_v47, %v873_v51  ;;  %v893_v59 = vcombine.high %v841_v47, %v873_v51 }
  0xbe   : > { %v673_v60 = vrot.slane %v659_v54, %v4051_v34  ;;  %v689_v35 = vrot.slane %v675_v55, %v4051_v34  ;;  %v706_v42 = vcombine.low %v641_v56, %v657_v57  ;;  %v777_v41 = vrot.slane %v763_v58, %v4051_v34 }
  0xbf   : > { %v906_v43 = vpack.c.bf16 %v890_v27, %v754_v30  ;;  %v907_v61 = vpack.c.bf16 %v891_v32, %v755_v36  ;;  %v908_v6 = vpack.c.bf16 %v892_v33, %v756_v40  ;;  %v909_v7 = vpack.c.bf16 %v893_v59, %v757_v45 }
  0xc0   : > { %v738_v8 = vcombine.low %v673_v60, %v689_v35  ;;  %v793_v52 = vrot.slane %v779_v26, %v4051_v34  ;;  %v795_v53 = vcombine.high %v4147_v1, %v4153_v4  ;;  %v714_v62 = vrot.slane %v706_v42, %v4059_v38 }
  0xc1   : > { %923 = vst.msk [vmem:[#allocation2 + $0x40] sm:$0xff] %vm914_vm0, %v906_v43  ;;  %924 = vst.msk [vmem:[#allocation2 + $0x48] sm:$0xff] %vm914_vm0, %v907_v61  ;;  %v811_v63 = vcombine.high %v4150_v3, %v4156_v5  ;;  %v707_v9 = vcombine.high %v641_v56, %v657_v57  ;;  %v739_v11 = vcombine.high %v673_v60, %v689_v35 }
  0xc2   : > { %925 = vst.msk [vmem:[#allocation2 + $0x50] sm:$0xff] %vm914_vm0, %v908_v6  ;;  %926 = vst.msk [vmem:[#allocation2 + $0x58] sm:$0xff] %vm914_vm0, %v909_v7  ;;  %v746_v12 = vrot.slane %v738_v8, %v4059_v38  ;;  %v809_v13 = vrot.slane %v795_v53, %v4051_v34  ;;  %v842_v1 = vcombine.low %v777_v41, %v793_v52 }
  0xc3   : > { %v843_v4 = vcombine.high %v777_v41, %v793_v52  ;;  %v825_v14 = vrot.slane %v811_v63, %v4051_v34  ;;  %v721_v15 = vrot.slane %v707_v9, %v4059_v38  ;;  %v753_v16 = vrot.slane %v739_v11, %v4059_v38 }
  0xc4   : > { %v850_v17 = vrot.slane %v842_v1, %v4059_v38  ;;  %v758_v5 = vcombine.low %v714_v62, %v746_v12  ;;  %v759_v21 = vcombine.high %v714_v62, %v746_v12 }
  0xc5   : > { %v874_v19 = vcombine.low %v809_v13, %v825_v14  ;;  %v857_v20 = vrot.slane %v843_v4, %v4059_v38  ;;  %v875_v3 = vcombine.high %v809_v13, %v825_v14  ;;  %v760_v23 = vcombine.low %v721_v15, %v753_v16 }
  0xc6   : > { %v761_v0 = vcombine.high %v721_v15, %v753_v16 }
  0xc7   : > { %v882_v22 = vrot.slane %v874_v19, %v4059_v38  ;;  %v889_v24 = vrot.slane %v875_v3, %v4059_v38 }
  0xc9   : > { %v894_v2 = vcombine.low %v850_v17, %v882_v22  ;;  %v895_v34 = vcombine.high %v850_v17, %v882_v22  ;;  %v896_v10 = vcombine.low %v857_v20, %v889_v24  ;;  %v897_v18 = vcombine.high %v857_v20, %v889_v24 }
  0xcb   : > { %v910_v25 = vpack.c.bf16 %v894_v2, %v758_v5  ;;  %v911_v28 = vpack.c.bf16 %v895_v34, %v759_v21  ;;  %v912_v29 = vpack.c.bf16 %v896_v10, %v760_v23  ;;  %v913_v30 = vpack.c.bf16 %v897_v18, %v761_v0 }
  0xcd   : > { %927 = vst.msk [vmem:[#allocation2 + $0x60] sm:$0xff] %vm914_vm0, %v910_v25  ;;  %928 = vst.msk [vmem:[#allocation2 + $0x68] sm:$0xff] %vm914_vm0, %v911_v28 }
  0xce   : > { %929 = vst.msk [vmem:[#allocation2 + $0x70] sm:$0xff] %vm914_vm0, %v912_v29  ;;  %930 = vst.msk [vmem:[#allocation2 + $0x78] sm:$0xff] %vm914_vm0, %v913_v30 }
  0xcf PF: > { %v934_v38 = vld [vmem:[%s3962_s12 + $0x10] sm:$0xff]  ;;  %s5018_s30 = sld [smem:[#allocation22_spill]]  ;;  %vm966_vm1 = vcmask 130048   ;;  %v932_v36 = vld [vmem:[%s3962_s12] sm:$0xff]  ;;  %v935_v40 = vld [vmem:[%s3962_s12 + $0x18] sm:$0xff]  ;;  %s5019_s14 = sld [smem:[#allocation15_spill]] }
  0xd0   : > { %v933_v45 = vld [vmem:[%s3962_s12 + $0x8] sm:$0xff]  ;;  %v936_v49 = vld [vmem:[%s3962_s12 + $0x20] sm:$0xff]  ;;  %v939_v58 = vld [vmem:[%s3962_s12 + $0x38] sm:$0xff]  ;;  %vm3652_vm2 = vmmov 0   ;;  %vm2747_vm3 = vcmask 261120   ;;  %s5020_s18 = sld [smem:[#allocation16_spill]] }
  0xd1   : > { %v937_v48 = vld [vmem:[%s3962_s12 + $0x28] sm:$0xff]  ;;  %v938_v26 = vld [vmem:[%s3962_s12 + $0x30] sm:$0xff]  ;;  %v940_v35 = vld [vmem:[%s3962_s12 + $0x40] sm:$0xff]  ;;  %s5021_s29 = sld [smem:[#allocation24_spill]]  ;;  %s5022_s28 = sld [smem:[#allocation19_spill]] }
  0xd2   : > { %v941_v60 = vld [vmem:[%s3962_s12 + $0x48] sm:$0xff]  ;;  %v943_v6 = vld [vmem:[%s3962_s12 + $0x58] sm:$0xff]  ;;  %v942_v7 = vld [vmem:[%s3962_s12 + $0x50] sm:$0xff]  ;;  %s3655_s4 = smov [#allocation9]  }
  0xd3   : > { %v945_v63 = vld [vmem:[%s3962_s12 + $0x68] sm:$0xff]  ;;  %v944_v9 = vld [vmem:[%s3962_s12 + $0x60] sm:$0xff]  ;;  %v947_v4 = vld [vmem:[%s3962_s12 + $0x78] sm:$0xff]  ;;  %s3515_s22 = sshll.u32 %s3655_s4, 4  ;;  %s3516_s22 = int_to_ptr.vmem [resolvable:$false] %s3515_s22 }
  0xd4   : > { %v946_v14 = vld [vmem:[%s3962_s12 + $0x70] sm:$0xff]  ;;  %v1120_v20 = vld [vmem:[%s3969_s13 + $0x8] sm:$0xff]  ;;  %v1119_v5 = vld [vmem:[%s3969_s13] sm:$0xff] }
  0xd5   : > { %v948_v31 = vld [vmem:[%s5018_s30] sm:$0xff]  ;;  %v949_v44 = vld [vmem:[%s5018_s30 + $0x8] sm:$0xff]  ;;  %s2941_s0 = sshll.u32 %s5019_s14, 3  ;;  %v1122_v0 = vld [vmem:[%s3969_s13 + $0x18] sm:$0xff]  ;;  %s2976_s10 = sshll.u32 %s5019_s14, 7 }
  0xd6   : > { %v4229_v37 = vadd.f32 %v948_v31, %v934_v38  ;;  %v4231_v39 = vadd.f32 %v948_v31, %v932_v36  ;;  %v4238_v46 = vadd.f32 %v949_v44, %v935_v40  ;;  %v4240_v47 = vadd.f32 %v949_v44, %v933_v45  ;;  %s1135_s6 = scalar_lea.vmem %s5018_s30, %s2941_s0  ;;  %v1121_v2 = vld [vmem:[%s3969_s13 + $0x10] sm:$0xff]  ;;  %v1124_v28 = vld [vmem:[%s3969_s13 + $0x28] sm:$0xff]  ;;  %v1123_v29 = vld [vmem:[%s3969_s13 + $0x20] sm:$0xff]  ;;  %s4340_s12 = scalar_lea.vmem %s3976_s15, %s2976_s10 [#allocation8] }
  0xd7   : > { %v4252_v56 = vadd.f32 %v949_v44, %v937_v48  ;;  %v4254_v57 = vadd.f32 %v948_v31, %v936_v49  ;;  %v4262_v33 = vadd.f32 %v949_v44, %v939_v58  ;;  %v4264_v59 = vadd.f32 %v948_v31, %v938_v26  ;;  %v4311_v3 = vld [vmem:[%s1135_s6] sm:$0xff]  ;;  %v1316_v38 = vld [vmem:[%s4340_s12 + $0x8] sm:$0xff]  ;;  %v1318_v40 = vld [vmem:[%s4340_s12 + $0x18] sm:$0xff]  ;;  %s2977_s11 = sshll.u32 %s5019_s14, 4  ;;  %s2781_s15 = sshll.u32 %s3982_s26, 4  ;;  %s4890_s15 = int_to_ptr.vmem [resolvable:$true] %s2781_s15 }
  0xd8   : > { %v973_v50 = vsel %vm966_vm1, %v4229_v37, -inf  ;;  %v967_v51 = vsel %vm966_vm1, %v4231_v39, -inf  ;;  %v976_v54 = vsel %vm966_vm1, %v4238_v46, -inf  ;;  %v970_v55 = vsel %vm966_vm1, %v4240_v47, -inf  ;;  %v1315_v30 = vld [vmem:[%s4340_s12] sm:$0xff]  ;;  %s2765_s14 = scalar_lea.sflag [#allocation5], %s3958_s21  ;;  %p3518_p2 = scmp.lt.s32.totalorder %s4890_s15, %s3516_s22 }
  0xd9   : > { %974 = vmax.xlane.f32.xlu1 %v973_v50  ;;  %968 = vmax.xlane.f32.xlu0 %v967_v51  ;;  %v982_v27 = vsel %vm966_vm1, %v4252_v56, -inf  ;;  %v979_v32 = vsel %vm966_vm1, %v4254_v57, -inf  ;;  %v988_v42 = vsel %vm966_vm1, %v4262_v33, -inf  ;;  %v985_v41 = vsel %vm966_vm1, %v4264_v59, -inf  ;;  %s3511_s0 = scalar_lea.vmem %s4890_s15, 2048  ;;  %p5023_p10 = scmp.ne.s32.totalorder %s5022_s28, 0 }
  0xda   : > { %v4272_v43 = vadd.f32 %v949_v44, %v941_v60  ;;  %v4274_v61 = vadd.f32 %v948_v31, %v940_v35  ;;  %v4282_v53 = vadd.f32 %v949_v44, %v943_v6  ;;  %v4284_v62 = vadd.f32 %v948_v31, %v942_v7  ;;  %v1128_v60 = vld [vmem:[%s3969_s13 + $0x48] sm:$0xff]  ;;  %v1127_v35 = vld [vmem:[%s3969_s13 + $0x40] sm:$0xff]  ;;  %p3512_p3 = scmp.ne.s32.totalorder %s4890_s15, %s3511_s0  ;;  %s3517_s6 = scalar_lea.vmem %s3516_s22, 4096 }
  0xdb   : > { %v4293_v13 = vadd.f32 %v949_v44, %v945_v63  ;;  %v4295_v1 = vadd.f32 %v948_v31, %v944_v9  ;;  %v4306_v17 = vadd.f32 %v949_v44, %v947_v4  ;;  %v4308_v19 = vadd.f32 %v948_v31, %v946_v14  ;;  %v1317_v31 = vld [vmem:[%s4340_s12 + $0x10] sm:$0xff]  ;;  %v1132_v4 = vld [vmem:[%s3969_s13 + $0x68] sm:$0xff]  ;;  %v1131_v14 = vld [vmem:[%s3969_s13 + $0x60] sm:$0xff]  ;;  %p3519_p1 = scmp.lt.s32.totalorder %s3517_s6, %s3511_s0 }
  0xdc   : > { %v994_v8 = vsel %vm966_vm1, %v4272_v43, -inf  ;;  %v991_v52 = vsel %vm966_vm1, %v4274_v61, -inf  ;;  %v1000_v11 = vsel %vm966_vm1, %v4282_v53, -inf  ;;  %v997_v12 = vsel %vm966_vm1, %v4284_v62, -inf  ;;  %p3513_p12 = pnand %p3512_p3, %p5023_p10 }
  0xdd   : > { %977 = vmax.xlane.f32.xlu1 %v976_v54  ;;  %971 = vmax.xlane.f32.xlu0 %v970_v55  ;;  %v1006_v15 = vsel %vm966_vm1, %v4293_v13, -inf  ;;  %v1003_v16 = vsel %vm966_vm1, %v4295_v1, -inf  ;;  %v1012_v21 = vsel %vm966_vm1, %v4306_v17, -inf  ;;  %v1009_v22 = vsel %vm966_vm1, %v4308_v19, -inf  ;;  %v1126_v54 = vld [vmem:[%s3969_s13 + $0x38] sm:$0xff]  ;;  %v1125_v55 = vld [vmem:[%s3969_s13 + $0x30] sm:$0xff]  ;;  %p3520_p0 = por %p3519_p1, %p3518_p2 }
  0xde   : > { %v4319_v23 = vadd.f32 %v4311_v3, %v1120_v20  ;;  %v4322_v24 = vadd.f32 %v4311_v3, %v1119_v5  ;;  %v4332_v18 = vadd.f32 %v4311_v3, %v1122_v0  ;;  %v4335_v25 = vadd.f32 %v4311_v3, %v1121_v2  ;;  %p3514_p6 = pneg %p3513_p12 }
  0xdf   : > { %v1331_v36 = vpack.c.bf16 %v1316_v38, %v1315_v30  ;;  %v1332_v44 = vpack.c.bf16 %v1318_v40, %v1317_v31  ;;  %v4351_v49 = vadd.f32 %v4311_v3, %v1124_v28  ;;  %v4354_v50 = vadd.f32 %v4311_v3, %v1123_v29 }
  0xe0   : > { %v1156_v34 = vsel %vm966_vm1, %v4319_v23, -inf  ;;  %v1153_v10 = vsel %vm966_vm1, %v4322_v24, -inf  ;;  %v1162_v45 = vsel %vm966_vm1, %v4332_v18, -inf  ;;  %v1159_v48 = vsel %vm966_vm1, %v4335_v25, -inf  ;;  %p3521_p5 = pnand %p3520_p0, %p3514_p6 }
  0xe1   : > { %983 = vmax.xlane.f32.xlu1 %v982_v27  ;;  %980 = vmax.xlane.f32.xlu0 %v979_v32  ;;  %v3651_v51 = vmov 0.0   ;;  %v1168_v58 = vsel %vm966_vm1, %v4351_v49, -inf  ;;  %v1165_v26 = vsel %vm966_vm1, %v4354_v50, -inf  ;;  %v4369_v27 = vadd.f32 %v4311_v3, %v1126_v54 }
  0xe2   : > { %3026 = vmatprep.subr.bf16.mxu0 %v3651_v51  ;;  %3032 = vmatprep.subr.bf16.mxu1 %v3651_v51  ;;  %v4372_v32 = vadd.f32 %v4311_v3, %v1125_v55  ;;  %v4383_v6 = vadd.f32 %v4311_v3, %v1128_v60  ;;  %v4386_v7 = vadd.f32 %v4311_v3, %v1127_v35 }
  0xe3   : > { %3027 = vmatpush3.bf16.msra.mxu0 %v1331_v36  ;;  %3033 = vmatpush3.bf16.msra.mxu1 %v1332_v44  ;;  %v4407_v20 = vadd.f32 %v4311_v3, %v1132_v4  ;;  %v4410_v5 = vadd.f32 %v4311_v3, %v1131_v14 }
  0xe4   : > { %3028 = vmatprep.mubr.msk.bf16.mxu0 %vm3652_vm2, %v3651_v51  ;;  %3034 = vmatprep.mubr.msk.bf16.mxu1 %vm3652_vm2, %v3651_v51  ;;  %v1180_v63 = vsel %vm966_vm1, %v4383_v6, -inf  ;;  %v1177_v9 = vsel %vm966_vm1, %v4386_v7, -inf }
  0xe5   : > { %989 = vmax.xlane.f32.xlu1 %v988_v42  ;;  %986 = vmax.xlane.f32.xlu0 %v985_v41  ;;  %v1174_v42 = vsel %vm966_vm1, %v4369_v27, -inf  ;;  %v1171_v41 = vsel %vm966_vm1, %v4372_v32, -inf  ;;  %v1192_v0 = vsel %vm966_vm1, %v4407_v20, -inf  ;;  %v1189_v2 = vsel %vm966_vm1, %v4410_v5, -inf }
  0xe6   : > { %3038 = vmatprep.subr.bf16.mxu0 %v3651_v51  ;;  %3044 = vmatprep.subr.bf16.mxu1 %v3651_v51 }
  0xe9   : > { %995 = vmax.xlane.f32.xlu1 %v994_v8  ;;  %992 = vmax.xlane.f32.xlu0 %v991_v52  ;;  %v1130_v8 = vld [vmem:[%s3969_s13 + $0x58] sm:$0xff]  ;;  %v1129_v52 = vld [vmem:[%s3969_s13 + $0x50] sm:$0xff] }
  0xed   : > { %1001 = vmax.xlane.f32.xlu1 %v1000_v11  ;;  %998 = vmax.xlane.f32.xlu0 %v997_v12  ;;  %v4395_v11 = vadd.f32 %v4311_v3, %v1130_v8  ;;  %v4398_v12 = vadd.f32 %v4311_v3, %v1129_v52 }
  0xf1   : > { %1007 = vmax.xlane.f32.xlu1 %v1006_v15  ;;  %1004 = vmax.xlane.f32.xlu0 %v1003_v16  ;;  %v1186_v15 = vsel %vm966_vm1, %v4395_v11, -inf  ;;  %v1183_v16 = vsel %vm966_vm1, %v4398_v12, -inf }
  0xf5   : > { %1013 = vmax.xlane.f32.xlu1 %v1012_v21  ;;  %1010 = vmax.xlane.f32.xlu0 %v1009_v22  ;;  %v1134_v21 = vld [vmem:[%s3969_s13 + $0x78] sm:$0xff]  ;;  %v1133_v22 = vld [vmem:[%s3969_s13 + $0x70] sm:$0xff]  ;;  %s2970_s13 = sshll.u32 %s5020_s18, 5 }
  0xf6   : > { %s4860_s5 = sadd.s32 %s2977_s11, %s2970_s13 }
  0xf7   : > { %s2971_s2 = sshll.u32 %s4860_s5, 7 }
  0xf8   : > { %s4888_s27 = scalar_lea.hbm %s5021_s29, %s2971_s2 }
  0xf9   : > { %1157 = vmax.xlane.f32.xlu1 %v1156_v34  ;;  %1154 = vmax.xlane.f32.xlu0 %v1153_v10  ;;  %v4419_v34 = vadd.f32 %v4311_v3, %v1134_v21  ;;  %v4422_v10 = vadd.f32 %v4311_v3, %v1133_v22  ;;  %v1320_v21 = vld [vmem:[%s4340_s12 + $0x28] sm:$0xff]  ;;  %v1322_v22 = vld [vmem:[%s4340_s12 + $0x38] sm:$0xff] }
  0xfb   : > { %v1198_v28 = vsel %vm966_vm1, %v4419_v34, -inf  ;;  %v1195_v29 = vsel %vm966_vm1, %v4422_v10, -inf }
  0xfd   : > { %1163 = vmax.xlane.f32.xlu1 %v1162_v45  ;;  %1160 = vmax.xlane.f32.xlu0 %v1159_v48 }
 0x101   : > { %1169 = vmax.xlane.f32.xlu1 %v1168_v58  ;;  %1166 = vmax.xlane.f32.xlu0 %v1165_v26 }
 0x105   : > { %1175 = vmax.xlane.f32.xlu1 %v1174_v42  ;;  %1172 = vmax.xlane.f32.xlu0 %v1171_v41 }
 0x109   : > { %1181 = vmax.xlane.f32.xlu1 %v1180_v63  ;;  %1178 = vmax.xlane.f32.xlu0 %v1177_v9 }
 0x10d   : > { %1187 = vmax.xlane.f32.xlu1 %v1186_v15  ;;  %1184 = vmax.xlane.f32.xlu0 %v1183_v16 }
 0x111   : > { %1193 = vmax.xlane.f32.xlu1 %v1192_v0  ;;  %1190 = vmax.xlane.f32.xlu0 %v1189_v2 }
 0x115   : > { %1199 = vmax.xlane.f32.xlu1 %v1198_v28  ;;  %1196 = vmax.xlane.f32.xlu0 %v1195_v29 }
 0x166   : > { %v975_v30 = vpop.xlane.xlu1 %974  ;;  %v969_v38 = vpop.xlane.xlu0 %968 }
 0x167   : > { %v1017_v31 = vsub.f32 %v4229_v37, %v975_v30  ;;  %v1015_v36 = vsub.f32 %v4231_v39, %v969_v38 }
 0x169   : > { %v1031_v40 = vmul.f32 1.442695, %v1015_v36  ;;  %v1035_v44 = vmul.f32 1.442695, %v1017_v31 }
 0x16a   : > { %v978_v3 = vpop.xlane.xlu1 %977  ;;  %v972_v45 = vpop.xlane.xlu0 %971 }
 0x16b   : > { %v1018_v48 = vsub.f32 %v4238_v46, %v978_v3  ;;  %v1016_v54 = vsub.f32 %v4240_v47, %v972_v45  ;;  %3293 = vpow2.f32 %v1031_v40 }
 0x16c   : > { %3295 = vpow2.f32 %v1035_v44 }
 0x16d   : > { %v1037_v55 = vmul.f32 1.442695, %v1018_v48  ;;  %v1033_v58 = vmul.f32 1.442695, %v1016_v54 }
 0x16e   : > { %v984_v26 = vpop.xlane.xlu1 %983  ;;  %v981_v60 = vpop.xlane.xlu0 %980 }
 0x16f   : > { %3297 = vpow2.f32 %v1037_v55  ;;  %v1020_v35 = vsub.f32 %v4252_v56, %v984_v26  ;;  %v1019_v37 = vsub.f32 %v4254_v57, %v981_v60  ;;  %v1319_v57 = vld [vmem:[%s4340_s12 + $0x20] sm:$0xff] }
 0x170   : > { %3299 = vpow2.f32 %v1033_v58  ;;  %v1333_v36 = vpack.c.bf16 %v1320_v21, %v1319_v57  ;;  %v1323_v26 = vld [vmem:[%s4340_s12 + $0x40] sm:$0xff] }
 0x171   : > { %v1039_v39 = vmul.f32 1.442695, %v1019_v37  ;;  %v1041_v42 = vmul.f32 1.442695, %v1020_v35 }
 0x172   : > { %v990_v41 = vpop.xlane.xlu1 %989  ;;  %v987_v46 = vpop.xlane.xlu0 %986 }
 0x173   : > { %v1022_v47 = vsub.f32 %v4262_v33, %v990_v41  ;;  %v1021_v8 = vsub.f32 %v4264_v59, %v987_v46  ;;  %3301 = vpow2.f32 %v1039_v39  ;;  %v1321_v33 = vld [vmem:[%s4340_s12 + $0x30] sm:$0xff]  ;;  %v1324_v39 = vld [vmem:[%s4340_s12 + $0x48] sm:$0xff]  ;;  %v1326_v41 = vld [vmem:[%s4340_s12 + $0x58] sm:$0xff] }
 0x174   : > { %3303 = vpow2.f32 %v1041_v42  ;;  %v1334_v40 = vpack.c.bf16 %v1322_v22, %v1321_v33  ;;  %v1325_v42 = vld [vmem:[%s4340_s12 + $0x50] sm:$0xff] }
 0x175   : > { %v1045_v52 = vmul.f32 1.442695, %v1022_v47  ;;  %v1043_v63 = vmul.f32 1.442695, %v1021_v8  ;;  %v3294_v9 = vpop.eup %3293 }
 0x176   : > { %v996_v56 = vpop.xlane.xlu1 %995  ;;  %v993_v4 = vpop.xlane.xlu0 %992  ;;  %v1063_v16 = vsel %vm966_vm1, %v3294_v9, 0.0 }
 0x177   : > { %3305 = vpow2.f32 %v1045_v52  ;;  %v1024_v14 = vsub.f32 %v4272_v43, %v996_v56  ;;  %v1023_v15 = vsub.f32 %v4274_v61, %v993_v4  ;;  %v3296_v0 = vpop.eup %3295  ;;  %1064 = vadd.xlane.f32.xlu0 %v1063_v16  ;;  %v1336_v56 = vpack.c.bf16 %v1326_v41, %v1325_v42 }
 0x178   : > { %3307 = vpow2.f32 %v1043_v63  ;;  %v1069_v3 = vsel %vm966_vm1, %v3296_v0, 0.0 }
 0x179   : > { %v3298_v59 = vpop.eup %3297  ;;  %v1049_v2 = vmul.f32 1.442695, %v1024_v14  ;;  %v1047_v28 = vmul.f32 1.442695, %v1023_v15 }
 0x17a   : > { %v3300_v29 = vpop.eup %3299  ;;  %v1002_v30 = vpop.xlane.xlu1 %1001  ;;  %v1112_v31 = vpack.c.bf16 %v3298_v59, %v3296_v0  ;;  %v1072_v58 = vsel %vm966_vm1, %v3298_v59, 0.0 }
 0x17b   : > { %v999_v38 = vpop.xlane.xlu0 %998  ;;  %v1026_v43 = vsub.f32 %v4282_v53, %v1002_v30  ;;  %v1066_v44 = vsel %vm966_vm1, %v3300_v29, 0.0  ;;  %3309 = vpow2.f32 %v1047_v28  ;;  %1070 = vadd.xlane.f32.xlu0 %v1069_v3  ;;  %v1111_v45 = vpack.c.bf16 %v3300_v29, %v3294_v9 }
 0x17c   : > { %v1025_v61 = vsub.f32 %v4284_v62, %v999_v38  ;;  %1067 = vadd.xlane.f32.xlu1 %v1066_v44  ;;  %3311 = vpow2.f32 %v1049_v2  ;;  %3035 = vmatmul.mubr.msk.bf16.vlgmr.msra.gmra.mrb[0].mxu1 %vm966_vm1, %v1112_v31  ;;  %v1335_v9 = vpack.c.bf16 %v1324_v39, %v1323_v26  ;;  %v1327_v2 = vld [vmem:[%s4340_s12 + $0x60] sm:$0xff]  ;;  %v1328_v31 = vld [vmem:[%s4340_s12 + $0x68] sm:$0xff] }
 0x17d   : > { %v1053_v48 = vmul.f32 1.442695, %v1026_v43  ;;  %v3302_v53 = vpop.eup %3301  ;;  %3029 = vmatmul.mubr.msk.bf16.vlgmr.msra.gmra.mrb[0].mxu0 %vm966_vm1, %v1111_v45  ;;  %3045 = vmatpush3.bf16.msra.mxu1 %v1334_v40  ;;  %v1330_v40 = vld [vmem:[%s4340_s12 + $0x78] sm:$0xff] }
 0x17e   : > { %v1051_v54 = vmul.f32 1.442695, %v1025_v61  ;;  %v1008_v62 = vpop.xlane.xlu1 %1007  ;;  %3039 = vmatpush3.bf16.msra.mxu0 %v1333_v36  ;;  %v1075_v37 = vsel %vm966_vm1, %v3302_v53, 0.0  ;;  %3040 = vmatprep.mubr.msk.bf16.mxu0 %vm3652_vm2, %v3651_v51  ;;  %v3304_v46 = vpop.eup %3303  ;;  %v1329_v36 = vld [vmem:[%s4340_s12 + $0x70] sm:$0xff] }
 0x17f   : > { %v1005_v55 = vpop.xlane.xlu0 %1004  ;;  %3313 = vpow2.f32 %v1053_v48  ;;  %v1028_v60 = vsub.f32 %v4293_v13, %v1008_v62  ;;  %1076 = vadd.xlane.f32.xlu0 %v1075_v37  ;;  %3046 = vmatprep.mubr.msk.bf16.mxu1 %vm3652_vm2, %v3651_v51  ;;  %v1078_v14 = vsel %vm966_vm1, %v3304_v46, 0.0  ;;  %v1113_v16 = vpack.c.bf16 %v3304_v46, %v3302_v53 }
 0x180   : > { %v1027_v35 = vsub.f32 %v4295_v1, %v1005_v55  ;;  %3315 = vpow2.f32 %v1051_v54  ;;  %1073 = vadd.xlane.f32.xlu1 %v1072_v58  ;;  %3050 = vmatprep.subr.bf16.mxu0 %v3651_v51  ;;  %v1337_v48 = vpack.c.bf16 %v1328_v31, %v1327_v2  ;;  %v1338_v54 = vpack.c.bf16 %v1330_v40, %v1329_v36  ;;  %v1693_v36 = vld [vmem:[#allocation2 + $0x10] sm:$0xff]  ;;  %v1694_v40 = vld [vmem:[#allocation2 + $0x18] sm:$0xff] }
 0x181   : > { %v3306_v47 = vpop.eup %3305  ;;  %v1057_v8 = vmul.f32 1.442695, %v1028_v60  ;;  %3056 = vmatprep.subr.bf16.mxu1 %v3651_v51 }
 0x182   : > { %v3308_v13 = vpop.eup %3307  ;;  %v1055_v1 = vmul.f32 1.442695, %v1027_v35  ;;  %v1014_v52 = vpop.xlane.xlu1 %1013  ;;  %v1084_v59 = vsel %vm966_vm1, %v3306_v47, 0.0 }
 0x183   : > { %v1011_v63 = vpop.xlane.xlu0 %1010  ;;  %v1030_v4 = vsub.f32 %v4306_v17, %v1014_v52  ;;  %v1081_v15 = vsel %vm966_vm1, %v3308_v13, 0.0  ;;  %v1114_v21 = vpack.c.bf16 %v3306_v47, %v3308_v13  ;;  %3317 = vpow2.f32 %v1057_v8 }
 0x184   : > { %v1029_v57 = vsub.f32 %v4308_v19, %v1011_v63  ;;  %1079 = vadd.xlane.f32.xlu1 %v1078_v14  ;;  %1082 = vadd.xlane.f32.xlu0 %v1081_v15  ;;  %3319 = vpow2.f32 %v1055_v1 }
 0x185   : > { %v1061_v33 = vmul.f32 1.442695, %v1030_v4  ;;  %v3310_v0 = vpop.eup %3309  ;;  %3041 = vmatmul.mubr.msk.bf16.vlgmr.msra.gmra.mrb[4].mxu0 %vm966_vm1, %v1113_v16  ;;  %3047 = vmatmul.mubr.msk.bf16.vlgmr.msra.gmra.mrb[4].mxu1 %vm966_vm1, %v1114_v21 }
 0x186   : > { %v1059_v22 = vmul.f32 1.442695, %v1029_v57  ;;  %v1158_v17 = vpop.xlane.xlu1 %1157  ;;  %v3312_v28 = vpop.eup %3311  ;;  %3051 = vmatpush3.bf16.msra.mxu0 %v1335_v9  ;;  %3057 = vmatpush3.bf16.msra.mxu1 %v1336_v56  ;;  %v1087_v38 = vsel %vm966_vm1, %v3310_v0, 0.0  ;;  %v1691_v9 = vld [vmem:[#allocation2] sm:$0xff]  ;;  %v1692_v56 = vld [vmem:[#allocation2 + $0x8] sm:$0xff] }
 0x187   : > { %v1155_v19 = vpop.xlane.xlu0 %1154  ;;  %3321 = vpow2.f32 %v1061_v33  ;;  %v1202_v29 = vsub.f32 %v4319_v23, %v1158_v17  ;;  %3052 = vmatprep.mubr.msk.bf16.mxu0 %vm3652_vm2, %v3651_v51  ;;  %3058 = vmatprep.mubr.msk.bf16.mxu1 %vm3652_vm2, %v3651_v51  ;;  %v1090_v45 = vsel %vm966_vm1, %v3312_v28, 0.0  ;;  %v1115_v58 = vpack.c.bf16 %v3312_v28, %v3310_v0 }
 0x188   : > { %v1201_v30 = vsub.f32 %v4322_v24, %v1155_v19  ;;  %3323 = vpow2.f32 %v1059_v22  ;;  %1085 = vadd.xlane.f32.xlu1 %v1084_v59  ;;  %1088 = vadd.xlane.f32.xlu0 %v1087_v38 }
 0x189   : > { %v4477_v43 = vpop.eup %3313  ;;  %v1219_v61 = vmul.f32 1.442695, %v1202_v29  ;;  %3062 = vmatprep.subr.bf16.mxu0 %v3651_v51  ;;  %3068 = vmatprep.subr.bf16.mxu1 %v3651_v51 }
 0x18a   : > { %v1217_v44 = vmul.f32 1.442695, %v1201_v30  ;;  %v4483_v23 = vpop.eup %3315  ;;  %v1164_v24 = vpop.xlane.xlu1 %1163 }
 0x18b   : > { %v1161_v3 = vpop.xlane.xlu0 %1160  ;;  %3325 = vpow2.f32 %v1219_v61  ;;  %v1204_v53 = vsub.f32 %v4332_v18, %v1164_v24  ;;  %v1116_v55 = vpack.c.bf16 %v4477_v43, %v4483_v23 }
 0x18c   : > { %v1203_v62 = vsub.f32 %v4335_v25, %v1161_v3  ;;  %3327 = vpow2.f32 %v1217_v44  ;;  %1091 = vadd.xlane.f32.xlu1 %v1090_v45 }
 0x18d   : > { %v1223_v26 = vmul.f32 1.442695, %v1204_v53  ;;  %3053 = vmatmul.mubr.msk.bf16.vlgmr.msra.gmra.mrb[8].mxu0 %vm966_vm1, %v1115_v58  ;;  %3059 = vmatmul.mubr.msk.bf16.vlgmr.msra.gmra.mrb[8].mxu1 %vm966_vm1, %v1116_v55  ;;  %v4494_v39 = vpop.eup %3317 }
 0x18e   : > { %v1221_v60 = vmul.f32 1.442695, %v1203_v62  ;;  %v1170_v35 = vpop.xlane.xlu1 %1169  ;;  %3063 = vmatpush3.bf16.msra.mxu0 %v1337_v48  ;;  %3069 = vmatpush3.bf16.msra.mxu1 %v1338_v54  ;;  %v4498_v42 = vpop.eup %3319 }
 0x18f   : > { %v1167_v37 = vpop.xlane.xlu0 %1166  ;;  %3329 = vpow2.f32 %v1223_v26  ;;  %v1206_v18 = vsub.f32 %v4351_v49, %v1170_v35  ;;  %3064 = vmatprep.mubr.msk.bf16.mxu0 %vm3652_vm2, %v3651_v51  ;;  %3070 = vmatprep.mubr.msk.bf16.mxu1 %vm3652_vm2, %v3651_v51  ;;  %v1117_v63 = vpack.c.bf16 %v4494_v39, %v4498_v42 }
 0x190   : > { %v1205_v25 = vsub.f32 %v4354_v50, %v1167_v37  ;;  %3331 = vpow2.f32 %v1221_v60  ;;  %3074 = vmatprep.subr.bf16.mxu0 %v3651_v51  ;;  %3080 = vmatprep.subr.bf16.mxu1 %v3651_v51 }
 0x191   : > { %v4504_v41 = vpop.eup %3321  ;;  %v1227_v46 = vmul.f32 1.442695, %v1206_v18 }
 0x192   : > { %v1225_v47 = vmul.f32 1.442695, %v1205_v25  ;;  %v4508_v49 = vpop.eup %3323  ;;  %v1176_v50 = vpop.xlane.xlu1 %1175 }
 0x193   : > { %v1173_v8 = vpop.xlane.xlu0 %1172  ;;  %3333 = vpow2.f32 %v1227_v46  ;;  %v1208_v13 = vsub.f32 %v4369_v27, %v1176_v50  ;;  %v1118_v52 = vpack.c.bf16 %v4504_v41, %v4508_v49  ;;  %v1696_v50 = vld [vmem:[#allocation2 + $0x28] sm:$0xff] }
 0x194   : > { %v1207_v1 = vsub.f32 %v4372_v32, %v1173_v8  ;;  %3335 = vpow2.f32 %v1225_v47  ;;  %v1695_v47 = vld [vmem:[#allocation2 + $0x20] sm:$0xff] }
 0x195   : > { %v3326_v4 = vpop.eup %3325  ;;  %v1231_v57 = vmul.f32 1.442695, %v1208_v13  ;;  %3065 = vmatmul.mubr.msk.bf16.vlgmr.msra.gmra.mrb[12].mxu0 %vm966_vm1, %v1117_v63  ;;  %3071 = vmatmul.mubr.msk.bf16.vlgmr.msra.gmra.mrb[12].mxu1 %vm966_vm1, %v1118_v52 }
 0x196   : > { %v1229_v14 = vmul.f32 1.442695, %v1207_v1  ;;  %v3328_v15 = vpop.eup %3327  ;;  %v1182_v27 = vpop.xlane.xlu1 %1181  ;;  %v1252_v32 = vsel %vm966_vm1, %v3326_v4, 0.0  ;;  %3075 = vmatpush3.bf16.msra.mxu0 %v1691_v9  ;;  %3081 = vmatpush3.bf16.msra.mxu1 %v1692_v56  ;;  %v1298_v29 = vpack.c.bf16 %v3326_v4, %v3326_v4 }
 0x197   : > { %v1179_v16 = vpop.xlane.xlu0 %1178  ;;  %3337 = vpow2.f32 %v1231_v57  ;;  %v1210_v21 = vsub.f32 %v4383_v6, %v1182_v27  ;;  %v1249_v22 = vsel %vm966_vm1, %v3328_v15, 0.0  ;;  %1253 = vadd.xlane.f32.xlu1 %v1252_v32  ;;  %3076 = vmatprep.mubr.msk.bf16.mxu0 %vm3652_vm2, %v3651_v51  ;;  %v1297_v28 = vpack.c.bf16 %v3328_v15, %v3328_v15  ;;  %v1697_v15 = vld [vmem:[#allocation2 + $0x30] sm:$0xff]  ;;  %v1698_v27 = vld [vmem:[#allocation2 + $0x38] sm:$0xff] }
 0x198   : > { %v1209_v33 = vsub.f32 %v4386_v7, %v1179_v16  ;;  %3339 = vpow2.f32 %v1229_v14  ;;  %1250 = vadd.xlane.f32.xlu0 %v1249_v22  ;;  %3082 = vmatprep.mubr.msk.bf16.mxu1 %vm3652_vm2, %v3651_v51 }
 0x199   : > { %v4522_v0 = vpop.eup %3329  ;;  %v1235_v17 = vmul.f32 1.442695, %v1210_v21  ;;  %3086 = vmatprep.subr.bf16.mxu0 %v3651_v51  ;;  %3092 = vmatprep.subr.bf16.mxu1 %v3651_v51 }
 0x19a   : > { %v1233_v19 = vmul.f32 1.442695, %v1209_v33  ;;  %v3332_v59 = vpop.eup %3331  ;;  %v1188_v2 = vpop.xlane.xlu1 %1187  ;;  %v1258_v7 = vsel %vm966_vm1, %v4522_v0, 0.0  ;;  %v1300_v37 = vpack.c.bf16 %v4522_v0, %v4522_v0 }
 0x19b   : > { %v1185_v6 = vpop.xlane.xlu0 %1184  ;;  %3341 = vpow2.f32 %v1235_v17  ;;  %v1212_v30 = vsub.f32 %v4395_v11, %v1188_v2  ;;  %v1255_v31 = vsel %vm966_vm1, %v3332_v59, 0.0  ;;  %1259 = vadd.xlane.f32.xlu1 %v1258_v7  ;;  %v1299_v35 = vpack.c.bf16 %v3332_v59, %v3332_v59  ;;  %v1700_v7 = vld [vmem:[#allocation2 + $0x48] sm:$0xff] }
 0x19c   : > { %v1211_v38 = vsub.f32 %v4398_v12, %v1185_v6  ;;  %3343 = vpow2.f32 %v1233_v19  ;;  %1256 = vadd.xlane.f32.xlu0 %v1255_v31  ;;  %v1699_v6 = vld [vmem:[#allocation2 + $0x40] sm:$0xff]  ;;  %v1701_v31 = vld [vmem:[#allocation2 + $0x50] sm:$0xff] }
 0x19d   : > { %v4535_v61 = vpop.eup %3333  ;;  %v1239_v44 = vmul.f32 1.442695, %v1212_v30  ;;  %3077 = vmatmul.mubr.msk.bf16.vlgmr.msra.gmra.mrb[16].mxu0 %vm966_vm1, %v1297_v28  ;;  %3083 = vmatmul.mubr.msk.bf16.vlgmr.msra.gmra.mrb[16].mxu1 %vm966_vm1, %v1298_v29  ;;  %v1096_v28 = vsel %vm966_vm1, %v4477_v43, 0.0  ;;  %v1093_v29 = vsel %vm966_vm1, %v4483_v23, 0.0  ;;  %v1102_v23 = vsel %vm966_vm1, %v4494_v39, 0.0 }
 0x19e   : > { %v1237_v24 = vmul.f32 1.442695, %v1211_v38  ;;  %v4537_v3 = vpop.eup %3335  ;;  %v1194_v11 = vpop.xlane.xlu1 %1193  ;;  %v1264_v12 = vsel %vm966_vm1, %v4535_v61, 0.0  ;;  %3087 = vmatpush3.bf16.msra.mxu0 %v1693_v36  ;;  %3093 = vmatpush3.bf16.msra.mxu1 %v1694_v40  ;;  %v1302_v57 = vpack.c.bf16 %v4535_v61, %v4535_v61  ;;  %v1099_v38 = vsel %vm966_vm1, %v4498_v42, 0.0  ;;  %v1702_v36 = vld [vmem:[#allocation2 + $0x58] sm:$0xff] }
 0x19f   : > { %v1191_v45 = vpop.xlane.xlu0 %1190  ;;  %3345 = vpow2.f32 %v1239_v44  ;;  %v1214_v48 = vsub.f32 %v4407_v20, %v1194_v11  ;;  %v1261_v53 = vsel %vm966_vm1, %v4537_v3, 0.0  ;;  %1265 = vadd.xlane.f32.xlu1 %v1264_v12  ;;  %3094 = vmatprep.mubr.msk.bf16.mxu1 %vm3652_vm2, %v3651_v51  ;;  %v1301_v4 = vpack.c.bf16 %v4537_v3, %v4537_v3  ;;  %v1705_v3 = vld [vmem:[#allocation2 + $0x70] sm:$0xff]  ;;  %v1706_v11 = vld [vmem:[#allocation2 + $0x78] sm:$0xff] }
 0x1a0   : > { %v1213_v54 = vsub.f32 %v4410_v5, %v1191_v45  ;;  %3347 = vpow2.f32 %v1237_v24  ;;  %1262 = vadd.xlane.f32.xlu0 %v1261_v53  ;;  %3104 = vmatprep.subr.bf16.mxu1 %v3651_v51  ;;  %v1108_v40 = vsel %vm966_vm1, %v4504_v41, 0.0  ;;  %v1105_v61 = vsel %vm966_vm1, %v4508_v49, 0.0  ;;  %v1703_v41 = vld [vmem:[#allocation2 + $0x60] sm:$0xff]  ;;  %v1704_v49 = vld [vmem:[#allocation2 + $0x68] sm:$0xff] }
 0x1a1   : > { %v4547_v62 = vpop.eup %3337  ;;  %v1243_v55 = vmul.f32 1.442695, %v1214_v48  ;;  %3088 = vmatprep.mubr.msk.bf16.mxu0 %vm3652_vm2, %v3651_v51  ;;  %3098 = vmatprep.subr.bf16.mxu0 %v3651_v51 }
 0x1a2   : > { %v1241_v58 = vmul.f32 1.442695, %v1213_v54  ;;  %v4552_v26 = vpop.eup %3339  ;;  %v1200_v20 = vpop.xlane.xlu1 %1199  ;;  %v1270_v5 = vsel %vm966_vm1, %v4547_v62, 0.0  ;;  %v1304_v59 = vpack.c.bf16 %v4547_v62, %v4547_v62 }
 0x1a3   : > { %v1197_v60 = vpop.xlane.xlu0 %1196  ;;  %3349 = vpow2.f32 %v1243_v55  ;;  %v1216_v18 = vsub.f32 %v4419_v34, %v1200_v20  ;;  %v1267_v46 = vsel %vm966_vm1, %v4552_v26, 0.0  ;;  %1271 = vadd.xlane.f32.xlu1 %v1270_v5  ;;  %v1303_v19 = vpack.c.bf16 %v4552_v26, %v4552_v26 }
 0x1a4   : > { %v1215_v25 = vsub.f32 %v4422_v10, %v1197_v60  ;;  %3351 = vpow2.f32 %v1241_v58  ;;  %1268 = vadd.xlane.f32.xlu0 %v1267_v46 }
 0x1a5   : > { %v4565_v8 = vpop.eup %3341  ;;  %v1247_v13 = vmul.f32 1.442695, %v1216_v18  ;;  %3089 = vmatmul.mubr.msk.bf16.vlgmr.msra.gmra.mrb[20].mxu0 %vm966_vm1, %v1299_v35  ;;  %3095 = vmatmul.mubr.msk.bf16.vlgmr.msra.gmra.mrb[20].mxu1 %vm966_vm1, %v1300_v37 }
 0x1a6   : > { %v1245_v1 = vmul.f32 1.442695, %v1215_v25  ;;  %v4567_v52 = vpop.eup %3343  ;;  %v1276_v34 = vsel %vm966_vm1, %v4565_v8, 0.0  ;;  %3099 = vmatpush3.bf16.msra.mxu0 %v1695_v47  ;;  %3105 = vmatpush3.bf16.msra.mxu1 %v1696_v50  ;;  %v1306_v43 = vpack.c.bf16 %v4565_v8, %v4565_v8 }
 0x1a7   : > { %3353 = vpow2.f32 %v1247_v13  ;;  %v1273_v10 = vsel %vm966_vm1, %v4567_v52, 0.0  ;;  %1277 = vadd.xlane.f32.xlu1 %v1276_v34  ;;  %3106 = vmatprep.mubr.msk.bf16.mxu1 %vm3652_vm2, %v3651_v51  ;;  %v1305_v30 = vpack.c.bf16 %v4567_v52, %v4567_v52 }
 0x1a8   : > { %3355 = vpow2.f32 %v1245_v1  ;;  %1274 = vadd.xlane.f32.xlu0 %v1273_v10  ;;  %3116 = vmatprep.subr.bf16.mxu1 %v3651_v51 }
 0x1a9   : > { %v4575_v63 = vpop.eup %3345  ;;  %3100 = vmatprep.mubr.msk.bf16.mxu0 %vm3652_vm2, %v3651_v51  ;;  %3110 = vmatprep.subr.bf16.mxu0 %v3651_v51 }
 0x1aa   : > { %v4580_v9 = vpop.eup %3347  ;;  %v1282_v56 = vsel %vm966_vm1, %v4575_v63, 0.0  ;;  %v1308_v42 = vpack.c.bf16 %v4575_v63, %v4575_v63 }
 0x1ab   : > { %v1279_v14 = vsel %vm966_vm1, %v4580_v9, 0.0  ;;  %1283 = vadd.xlane.f32.xlu1 %v1282_v56  ;;  %v1307_v39 = vpack.c.bf16 %v4580_v9, %v4580_v9 }
 0x1ac   : > { %1280 = vadd.xlane.f32.xlu0 %v1279_v14 }
 0x1ad   : > { %v4593_v16 = vpop.eup %3349  ;;  %3101 = vmatmul.mubr.msk.bf16.vlgmr.msra.gmra.mrb[24].mxu0 %vm966_vm1, %v1301_v4  ;;  %3107 = vmatmul.mubr.msk.bf16.vlgmr.msra.gmra.mrb[24].mxu1 %vm966_vm1, %v1302_v57 }
 0x1ae   : > { %v4595_v32 = vpop.eup %3351  ;;  %v1288_v21 = vsel %vm966_vm1, %v4593_v16, 0.0  ;;  %3111 = vmatpush3.bf16.msra.mxu0 %v1697_v15  ;;  %3117 = vmatpush3.bf16.msra.mxu1 %v1698_v27  ;;  %v1310_v24 = vpack.c.bf16 %v4593_v16, %v4593_v16 }
 0x1af   : > { %v1285_v33 = vsel %vm966_vm1, %v4595_v32, 0.0  ;;  %1289 = vadd.xlane.f32.xlu1 %v1288_v21  ;;  %3118 = vmatprep.mubr.msk.bf16.mxu1 %vm3652_vm2, %v3651_v51  ;;  %v1309_v44 = vpack.c.bf16 %v4595_v32, %v4595_v32 }
 0x1b0   : > { %1286 = vadd.xlane.f32.xlu0 %v1285_v33  ;;  %3128 = vmatprep.subr.bf16.mxu1 %v3651_v51 }
 0x1b1   : > { %v4603_v22 = vpop.eup %3353  ;;  %3112 = vmatprep.mubr.msk.bf16.mxu0 %vm3652_vm2, %v3651_v51  ;;  %3122 = vmatprep.subr.bf16.mxu0 %v3651_v51 }
 0x1b2   : > { %v4608_v0 = vpop.eup %3355  ;;  %v1294_v17 = vsel %vm966_vm1, %v4603_v22, 0.0  ;;  %v1312_v12 = vpack.c.bf16 %v4603_v22, %v4603_v22 }
 0x1b3   : > { %v1291_v2 = vsel %vm966_vm1, %v4608_v0, 0.0  ;;  %1295 = vadd.xlane.f32.xlu1 %v1294_v17  ;;  %v1311_v45 = vpack.c.bf16 %v4608_v0, %v4608_v0 }
 0x1b4   : > { %1292 = vadd.xlane.f32.xlu0 %v1291_v2 }
 0x1b5   : > { %3113 = vmatmul.mubr.msk.bf16.vlgmr.msra.gmra.mrb[28].mxu0 %vm966_vm1, %v1303_v19  ;;  %3119 = vmatmul.mubr.msk.bf16.vlgmr.msra.gmra.mrb[28].mxu1 %vm966_vm1, %v1304_v59 }
 0x1b6   : > { %3123 = vmatpush3.bf16.msra.mxu0 %v1699_v6  ;;  %3129 = vmatpush3.bf16.msra.mxu1 %v1700_v7 }
 0x1b7   : > { %1097 = vadd.xlane.f32.xlu1 %v1096_v28  ;;  %3130 = vmatprep.mubr.msk.bf16.mxu1 %vm3652_vm2, %v3651_v51 }
 0x1b8   : > { %1094 = vadd.xlane.f32.xlu0 %v1093_v29  ;;  %3140 = vmatprep.subr.bf16.mxu1 %v3651_v51 }
 0x1b9   : > { %3124 = vmatprep.mubr.msk.bf16.mxu0 %vm3652_vm2, %v3651_v51  ;;  %3134 = vmatprep.subr.bf16.mxu0 %v3651_v51 }
 0x1bb   : > { %1103 = vadd.xlane.f32.xlu1 %v1102_v23 }
 0x1bc   : > { %1100 = vadd.xlane.f32.xlu0 %v1099_v38 }
 0x1bd   : > { %3125 = vmatmul.mubr.msk.bf16.vlgmr.msra.gmra.mrb[32].mxu0 %vm966_vm1, %v1305_v30  ;;  %3131 = vmatmul.mubr.msk.bf16.vlgmr.msra.gmra.mrb[32].mxu1 %vm966_vm1, %v1306_v43 }
 0x1be   : > { %3135 = vmatpush3.bf16.msra.mxu0 %v1701_v31  ;;  %3141 = vmatpush3.bf16.msra.mxu1 %v1702_v36 }
 0x1bf   : > { %1109 = vadd.xlane.f32.xlu1 %v1108_v40  ;;  %3136 = vmatprep.mubr.msk.bf16.mxu0 %vm3652_vm2, %v3651_v51 }
 0x1c0   : > { %1106 = vadd.xlane.f32.xlu0 %v1105_v61  ;;  %3142 = vmatprep.mubr.msk.bf16.mxu1 %vm3652_vm2, %v3651_v51 }
 0x1c1   : > { %3146 = vmatprep.subr.bf16.mxu0 %v3651_v51  ;;  %3152 = vmatprep.subr.bf16.mxu1 %v3651_v51 }
 0x1c5   : > { %3137 = vmatmul.mubr.msk.bf16.vlgmr.msra.gmra.mrb[36].mxu0 %vm966_vm1, %v1307_v39  ;;  %3143 = vmatmul.mubr.msk.bf16.vlgmr.msra.gmra.mrb[36].mxu1 %vm966_vm1, %v1308_v42 }
 0x1c6   : > { %3147 = vmatpush3.bf16.msra.mxu0 %v1703_v41  ;;  %3153 = vmatpush3.bf16.msra.mxu1 %v1704_v49 }
 0x1c7   : > { %3148 = vmatprep.mubr.msk.bf16.mxu0 %vm3652_vm2, %v3651_v51  ;;  %3154 = vmatprep.mubr.msk.bf16.mxu1 %vm3652_vm2, %v3651_v51 }
 0x1c8   : > { %3158 = vmatprep.subr.bf16.mxu0 %v3651_v51  ;;  %3164 = vmatprep.subr.bf16.mxu1 %v3651_v51 }
 0x1cd   : > { %3149 = vmatmul.mubr.msk.bf16.vlgmr.msra.gmra.mrb[40].mxu0 %vm966_vm1, %v1309_v44  ;;  %3155 = vmatmul.mubr.msk.bf16.vlgmr.msra.gmra.mrb[40].mxu1 %vm966_vm1, %v1310_v24 }
 0x1ce   : > { %3159 = vmatpush3.bf16.msra.mxu0 %v1705_v3  ;;  %3165 = vmatpush3.bf16.msra.mxu1 %v1706_v11 }
 0x1cf   : > { %3160 = vmatprep.mubr.msk.bf16.mxu0 %vm3652_vm2, %v3651_v51  ;;  %3166 = vmatprep.mubr.msk.bf16.mxu1 %vm3652_vm2, %v3651_v51 }
 0x1d5   : > { %3161 = vmatmul.mubr.msk.bf16.vlgmr.msra.gmra.mrb[44].mxu0 %vm966_vm1, %v1311_v45  ;;  %3167 = vmatmul.mubr.msk.bf16.vlgmr.msra.gmra.mrb[44].mxu1 %vm966_vm1, %v1312_v12  ;;  %v3653_v45 = vmov 1983009808  }
 0x1d6   : > { %v2462_v12 = vunpack.c.l.s4 %v3653_v45 }
 0x204   : > { %v4681_v48 = vpop.xlane.xlu0 %1064 }
 0x208   : > { %v4683_v54 = vpop.xlane.xlu0 %1070 }
 0x209   : > { %v1068_v51 = vpop.xlane.xlu1 %1067 }
 0x20c   : > { %v4685_v53 = vpop.xlane.xlu0 %1076 }
 0x20d   : > { %v1074_v26 = vpop.xlane.xlu1 %1073 }
 0x20e   : > { %3357 = vrcp.f32 %v1074_v26 }
 0x20f   : > { %3359 = vrcp.f32 %v1068_v51  ;;  %v2464_v51 = vlaneseq }
 0x211   : > { %v4687_v62 = vpop.xlane.xlu0 %1082  ;;  %v1080_v60 = vpop.xlane.xlu1 %1079 }
 0x212   : > { %3361 = vrcp.f32 %v1080_v60 }
 0x215   : > { %v4689_v55 = vpop.xlane.xlu0 %1088  ;;  %v4693_v35 = vpop.xlane.xlu1 %1085 }
 0x218   : > { %v3358_v47 = vpop.eup %3357 }
 0x219   : > { %v3360_v13 = vpop.eup %3359  ;;  %v4703_v10 = vpop.xlane.xlu1 %1091 }
 0x21c   : > { %v3362_v16 = vpop.eup %3361 }
 0x224   : > { %v1254_v56 = vpop.xlane.xlu1 %1253 }
 0x225   : > { %v1251_v58 = vpop.xlane.xlu0 %1250  ;;  %3363 = vrcp.f32 %v1254_v56 }
 0x226   : > { %3365 = vrcp.f32 %v1251_v58 }
 0x228   : > { %v1260_v17 = vpop.xlane.xlu1 %1259 }
 0x229   : > { %v1257_v20 = vpop.xlane.xlu0 %1256  ;;  %3367 = vrcp.f32 %v1260_v17 }
 0x22a   : > { %3369 = vrcp.f32 %v1257_v20 }
 0x22b   : > { %3371 = vrcp.f32 %v4681_v48 }
 0x22c   : > { %v1266_v23 = vpop.xlane.xlu1 %1265 }
 0x22d   : > { %v4691_v5 = vpop.xlane.xlu0 %1262  ;;  %3373 = vrcp.f32 %v1266_v23 }
 0x22e   : > { %3375 = vrcp.f32 %v4691_v5 }
 0x22f   : > { %v3364_v58 = vpop.eup %3363 }
 0x230   : > { %v1272_v44 = vpop.xlane.xlu1 %1271 }
 0x231   : > { %v4695_v37 = vpop.xlane.xlu0 %1268  ;;  %3377 = vrcp.f32 %v1272_v44 }
 0x232   : > { %3379 = vrcp.f32 %v4695_v37 }
 0x233   : > { %3381 = vrcp.f32 %v4683_v54  ;;  %v3654_v54 = vmov 1934713408  }
 0x234   : > { %3383 = vrcp.f32 %v4685_v53 }
 0x235   : > { %v4707_v4 = vpop.xlane.xlu0 %1274  ;;  %3385 = vrcp.f32 %v4687_v62 }
 0x236   : > { %3387 = vrcp.f32 %v4689_v55 }
 0x239   : > { %v4717_v19 = vpop.xlane.xlu0 %1280 }
 0x23d   : > { %v4727_v38 = vpop.xlane.xlu0 %1286 }
 0x241   : > { %v4737_v24 = vpop.xlane.xlu0 %1292 }
 0x245   : > { %v1095_v56 = vpop.xlane.xlu0 %1094 }
 0x24f   : > { %v4697_v18 = vpop.f32.mrb[0].mxu1 }
 0x250   : > { %v4699_v25 = vpop.f32.mrb[0].mxu0  ;;  %v3036_v46 = vpop.f32.mrb[1].mxu1 }
 0x251   : > { %v3030_v50 = vpop.f32.mrb[1].mxu0  ;;  %v1423_v8 = vpop.f32.mrb[2].mxu1 }
 0x252   : > { %v1379_v1 = vpop.f32.mrb[2].mxu0  ;;  %v4701_v52 = vmul.f32 %v3358_v47, %v1423_v8  ;;  %v3037_v34 = vpop.f32.mrb[3].mxu1 }
 0x253   : > { %v4705_v63 = vmul.f32 %v3360_v13, %v1379_v1  ;;  %v3031_v9 = vpop.f32.mrb[3].mxu0  ;;  %v2463_v13 = vunpack.c.0.s8 %v2462_v12  ;;  %v4739_v1 = vshrl.u32 %v2464_v51, 7  ;;  %v3366_v34 = vpop.eup %3365 }
 0x254   : > { %v3368_v20 = vpop.eup %3367  ;;  %v1278_v9 = vpop.xlane.xlu1 %1277 }
 0x255   : > { %v1101_v51 = vpop.xlane.xlu0 %1100  ;;  %3389 = vrcp.f32 %v1278_v9 }
 0x256   : > { %3391 = vrcp.f32 %v1095_v56 }
 0x257   : > { %3393 = vrcp.f32 %v1101_v51 }
 0x258   : > { %v4709_v57 = vpop.f32.mrb[4].mxu0  ;;  %v4711_v14 = vpop.f32.mrb[4].mxu1 }
 0x259   : > { %v3042_v15 = vpop.f32.mrb[5].mxu0  ;;  %v3048_v27 = vpop.f32.mrb[5].mxu1 }
 0x25a   : > { %v1467_v32 = vpop.f32.mrb[6].mxu0  ;;  %v4713_v21 = vpop.f32.mrb[6].mxu1 }
 0x25b   : > { %v4715_v33 = vmul.f32 %v3362_v16, %v1467_v32  ;;  %v3043_v22 = vpop.f32.mrb[7].mxu0  ;;  %v3049_v0 = vpop.f32.mrb[7].mxu1  ;;  %v4743_v16 = vsub.s32 %v2463_v13, %v4739_v1 }
 0x25c   : > { %v3370_v15 = vpop.eup %3369 }
 0x25d   : > { %v3372_v13 = vpop.eup %3371 }
 0x260   : > { %v4719_v59 = vpop.f32.mrb[8].mxu0  ;;  %v4721_v2 = vpop.f32.mrb[8].mxu1 }
 0x261   : > { %v3054_v6 = vpop.f32.mrb[9].mxu0  ;;  %v3060_v7 = vpop.f32.mrb[9].mxu1 }
 0x262   : > { %v4723_v28 = vpop.f32.mrb[10].mxu0  ;;  %v4725_v29 = vpop.f32.mrb[10].mxu1 }
 0x263   : > { %v3055_v30 = vpop.f32.mrb[11].mxu0  ;;  %v3061_v43 = vpop.f32.mrb[11].mxu1 }
 0x268   : > { %v4729_v31 = vpop.f32.mrb[12].mxu0  ;;  %v4731_v36 = vpop.f32.mrb[12].mxu1 }
 0x269   : > { %v3066_v40 = vpop.f32.mrb[13].mxu0  ;;  %v3072_v61 = vpop.f32.mrb[13].mxu1 }
 0x26a   : > { %v4733_v39 = vpop.f32.mrb[14].mxu0  ;;  %v4735_v42 = vpop.f32.mrb[14].mxu1 }
 0x26b   : > { %v3067_v41 = vpop.f32.mrb[15].mxu0  ;;  %v3073_v49 = vpop.f32.mrb[15].mxu1 }
 0x270   : > { %v1744_v3 = vpop.f32.mrb[16].mxu0  ;;  %v1787_v11 = vpop.f32.mrb[16].mxu1 }
 0x271   : > { %v3078_v26 = vpop.f32.mrb[17].mxu0  ;;  %v3084_v60 = vpop.f32.mrb[17].mxu1  ;;  %v2443_v22 = vmul.f32 %v3366_v34, %v1744_v3  ;;  %v2444_v0 = vmul.f32 %v3364_v58, %v1787_v11 }
 0x272   : > { %v1747_v46 = vpop.f32.mrb[18].mxu0  ;;  %v1790_v47 = vpop.f32.mrb[18].mxu1 }
 0x273   : > { %v3079_v50 = vpop.f32.mrb[19].mxu0  ;;  %v3085_v8 = vpop.f32.mrb[19].mxu1 }
 0x274   : > { %v1284_v26 = vpop.xlane.xlu1 %1283  ;;  %v3374_v34 = vpop.eup %3373 }
 0x278   : > { %v1830_v27 = vpop.f32.mrb[20].mxu0  ;;  %v1873_v32 = vpop.f32.mrb[20].mxu1 }
 0x279   : > { %v2445_v17 = vmul.f32 %v3370_v15, %v1830_v27  ;;  %v2446_v6 = vmul.f32 %v3368_v20, %v1873_v32  ;;  %v3090_v7 = vpop.f32.mrb[21].mxu0  ;;  %v3096_v30 = vpop.f32.mrb[21].mxu1 }
 0x27a   : > { %v1833_v43 = vpop.f32.mrb[22].mxu0  ;;  %v1876_v40 = vpop.f32.mrb[22].mxu1 }
 0x27b   : > { %v2459_v48 = vcombine.low %v2443_v22, %v2445_v17  ;;  %v2460_v61 = vcombine.high %v2443_v22, %v2445_v17  ;;  %v2475_v41 = vcombine.low %v2444_v0, %v2446_v6  ;;  %v2476_v49 = vcombine.high %v2444_v0, %v2446_v6  ;;  %v3091_v23 = vpop.f32.mrb[23].mxu0  ;;  %v3097_v45 = vpop.f32.mrb[23].mxu1 }
 0x27c   : > { %v3376_v22 = vpop.eup %3375  ;;  %v1107_v0 = vpop.xlane.xlu0 %1106  ;;  %v2526_v17 = vunpack.c.l.s4 %v3654_v54  ;;  %v2411_v54 = vmul.f32 %v3372_v13, %v4699_v25 }
 0x27d   : > { %v4747_v12 = vrot.slane %v2459_v48, %v4743_v16  ;;  %v4750_v3 = vrot.slane %v2460_v61, %v4743_v16  ;;  %v4753_v11 = vrot.slane %v2475_v41, %v4743_v16  ;;  %v4756_v5 = vrot.slane %v2476_v49, %v4743_v16  ;;  %v3378_v6 = vpop.eup %3377  ;;  %v4771_v53 = vpop.xlane.xlu1 %1289 }
 0x27e   : > { %3395 = vrcp.f32 %v1107_v0  ;;  %v3380_v7 = vpop.eup %3379  ;;  %v2527_v62 = vunpack.c.0.s8 %v2526_v17 }
 0x27f   : > { %v2523_v60 = vcombine.low %v4747_v12, %v4753_v11  ;;  %v2524_v44 = vcombine.high %v4747_v12, %v4753_v11  ;;  %v2539_v46 = vcombine.low %v4750_v3, %v4756_v5  ;;  %v2540_v47 = vcombine.high %v4750_v3, %v4756_v5  ;;  %v3382_v49 = vpop.eup %3381 }
 0x280   : > { %v1916_v50 = vpop.f32.mrb[24].mxu0  ;;  %v1959_v8 = vpop.f32.mrb[24].mxu1  ;;  %3397 = vrcp.f32 %v4707_v4  ;;  %v2413_v17 = vmul.f32 %v3382_v49, %v4697_v18 }
 0x281   : > { %v3102_v37 = vpop.f32.mrb[25].mxu0  ;;  %v3108_v58 = vpop.f32.mrb[25].mxu1  ;;  %v2447_v55 = vmul.f32 %v3376_v22, %v1916_v50  ;;  %v2448_v40 = vmul.f32 %v3374_v34, %v1959_v8  ;;  %3399 = vrcp.f32 %v1284_v26  ;;  %v4776_v50 = vsub.s32 %v2527_v62, %v4739_v1 }
 0x282   : > { %v1919_v20 = vpop.f32.mrb[26].mxu0  ;;  %v1962_v15 = vpop.f32.mrb[26].mxu1  ;;  %3401 = vrcp.f32 %v4717_v19 }
 0x283   : > { %v3103_v27 = vpop.f32.mrb[27].mxu0  ;;  %v3109_v32 = vpop.f32.mrb[27].mxu1  ;;  %v2531_v18 = vrot.slane %v2523_v60, %v4776_v50  ;;  %v2538_v25 = vrot.slane %v2524_v44, %v4776_v50  ;;  %v2547_v12 = vrot.slane %v2539_v46, %v4776_v50  ;;  %v2554_v11 = vrot.slane %v2540_v47, %v4776_v50 }
 0x284   : > { %v3384_v45 = vpop.eup %3383  ;;  %3403 = vrcp.f32 %v4771_v53 }
 0x285   : > { %v3386_v27 = vpop.eup %3385  ;;  %v2415_v19 = vmul.f32 %v3384_v45, %v4709_v57  ;;  %3405 = vrcp.f32 %v4727_v38 }
 0x286   : > { %v3388_v8 = vpop.eup %3387  ;;  %v2417_v1 = vmul.f32 %v3386_v27, %v4711_v14 }
 0x287   : > { %v4782_v0 = vpop.eup %3389 }
 0x288   : > { %v2002_v30 = vpop.f32.mrb[28].mxu0  ;;  %v2045_v43 = vpop.f32.mrb[28].mxu1 }
 0x289   : > { %v2449_v48 = vmul.f32 %v3380_v7, %v2002_v30  ;;  %v2450_v61 = vmul.f32 %v3378_v6, %v2045_v43  ;;  %v3114_v9 = vpop.f32.mrb[29].mxu0  ;;  %v3120_v41 = vpop.f32.mrb[29].mxu1 }
 0x28a   : > { %v2005_v56 = vpop.f32.mrb[30].mxu0  ;;  %v2048_v23 = vpop.f32.mrb[30].mxu1 }
 0x28b   : > { %v2491_v51 = vcombine.low %v2447_v55, %v2449_v48  ;;  %v2492_v37 = vcombine.high %v2447_v55, %v2449_v48  ;;  %v2507_v58 = vcombine.low %v2448_v40, %v2450_v61  ;;  %v2508_v20 = vcombine.high %v2448_v40, %v2450_v61  ;;  %v3115_v15 = vpop.f32.mrb[31].mxu0  ;;  %v3121_v4 = vpop.f32.mrb[31].mxu1 }
 0x28c   : > { %v3392_v6 = vpop.eup %3391  ;;  %v4788_v7 = vpop.xlane.xlu1 %1295  ;;  %v2419_v48 = vmul.f32 %v3388_v8, %v4719_v59 }
 0x28d   : > { %v2499_v34 = vrot.slane %v2491_v51, %v4743_v16  ;;  %v2506_v26 = vrot.slane %v2492_v37, %v4743_v16  ;;  %v2515_v32 = vrot.slane %v2507_v58, %v4743_v16  ;;  %v2522_v22 = vrot.slane %v2508_v20, %v4743_v16  ;;  %v3394_v40 = vpop.eup %3393 }
 0x28e   : > { %v2421_v61 = vmul.f32 %v3392_v6, %v4721_v2  ;;  %v3396_v13 = vpop.eup %3395  ;;  %v2423_v60 = vmul.f32 %v3394_v40, %v4729_v31  ;;  %3407 = vrcp.f32 %v4788_v7 }
 0x28f   : > { %v2555_v62 = vcombine.low %v2499_v34, %v2515_v32  ;;  %v2556_v30 = vcombine.high %v2499_v34, %v2515_v32  ;;  %v2571_v43 = vcombine.low %v2506_v26, %v2522_v22  ;;  %v2572_v55 = vcombine.high %v2506_v26, %v2522_v22  ;;  %v3398_v23 = vpop.eup %3397 }
 0x290   : > { %v2088_v57 = vpop.f32.mrb[32].mxu0  ;;  %v2131_v14 = vpop.f32.mrb[32].mxu1  ;;  %v2425_v45 = vmul.f32 %v3396_v13, %v4731_v36  ;;  %3409 = vrcp.f32 %v4737_v24 }
 0x291   : > { %v2563_v9 = vrot.slane %v2555_v62, %v4776_v50  ;;  %v2570_v41 = vrot.slane %v2556_v30, %v4776_v50  ;;  %v2579_v59 = vrot.slane %v2571_v43, %v4776_v50  ;;  %v2586_v2 = vrot.slane %v2572_v55, %v4776_v50  ;;  %v3126_v49 = vpop.f32.mrb[33].mxu0  ;;  %v3132_v56 = vpop.f32.mrb[33].mxu1 }
 0x292   : > { %v2091_v44 = vpop.f32.mrb[34].mxu0  ;;  %v2134_v51 = vpop.f32.mrb[34].mxu1  ;;  %3411 = vrcp.f32 %v4693_v35 }
 0x293   : > { %v2587_v37 = vcombine.low %v2531_v18, %v2563_v9  ;;  %v2588_v58 = vcombine.high %v2531_v18, %v2563_v9  ;;  %v2589_v20 = vcombine.low %v2538_v25, %v2570_v41  ;;  %v2590_v15 = vcombine.high %v2538_v25, %v2570_v41  ;;  %v3127_v4 = vpop.f32.mrb[35].mxu0  ;;  %v3133_v31 = vpop.f32.mrb[35].mxu1 }
 0x294   : > { %v3400_v36 = vpop.eup %3399  ;;  %v2591_v27 = vcombine.low %v2547_v12, %v2579_v59  ;;  %v2592_v8 = vcombine.high %v2547_v12, %v2579_v59  ;;  %v2593_v46 = vcombine.low %v2554_v11, %v2586_v2  ;;  %v2594_v34 = vcombine.high %v2554_v11, %v2586_v2  ;;  %v1098_v43 = vpop.xlane.xlu1 %1097 }
 0x295   : > { %v2731_v3 = vadd.f32 %v2587_v37, %v2411_v54  ;;  %v2733_v5 = vadd.f32 %v2588_v58, %v2413_v17  ;;  %v2735_v47 = vadd.f32 %v2589_v20, %v2415_v19  ;;  %v2737_v26 = vadd.f32 %v2590_v15, %v2417_v1  ;;  %v3402_v32 = vpop.eup %3401 }
 0x296   : > { %v2739_v22 = vadd.f32 %v2591_v27, %v2419_v48  ;;  %v2741_v6 = vadd.f32 %v2592_v8, %v2421_v61  ;;  %v2743_v62 = vadd.f32 %v2593_v46, %v2423_v60  ;;  %v2745_v30 = vadd.f32 %v2594_v34, %v2425_v45  ;;  %v3404_v51 = vpop.eup %3403 }
 0x297   : > { %2748 = vst.msk [vmem:[%s3982_s26] sm:$0xff] %vm2747_vm3, %v2731_v3  ;;  %2750 = vst.msk [vmem:[%s3982_s26 + $0x10] sm:$0xff] %vm2747_vm3, %v2733_v5  ;;  %v2451_v19 = vmul.f32 %v3398_v23, %v2088_v57  ;;  %v2452_v1 = vmul.f32 %v4782_v0, %v2131_v14  ;;  %v3406_v15 = vpop.eup %3405  ;;  %3413 = vrcp.f32 %v4703_v10 }
 0x298   : > { %2752 = vst.msk [vmem:[%s3982_s26 + $0x20] sm:$0xff] %vm2747_vm3, %v2735_v47  ;;  %2754 = vst.msk [vmem:[%s3982_s26 + $0x30] sm:$0xff] %vm2747_vm3, %v2737_v26  ;;  %v2174_v54 = vpop.f32.mrb[36].mxu0  ;;  %v2217_v17 = vpop.f32.mrb[36].mxu1  ;;  %3415 = vrcp.f32 %v1098_v43 }
 0x299   : > { %2756 = vst.msk [vmem:[%s3982_s26 + $0x40] sm:$0xff] %vm2747_vm3, %v2739_v22  ;;  %2758 = vst.msk [vmem:[%s3982_s26 + $0x50] sm:$0xff] %vm2747_vm3, %v2741_v6  ;;  %v2453_v55 = vmul.f32 %v3402_v32, %v2174_v54  ;;  %v2454_v40 = vmul.f32 %v3400_v36, %v2217_v17  ;;  %v3138_v48 = vpop.f32.mrb[37].mxu0  ;;  %v3144_v61 = vpop.f32.mrb[37].mxu1 }
 0x29a   : > { %2760 = vst.msk [vmem:[%s3982_s26 + $0x60] sm:$0xff] %vm2747_vm3, %v2743_v62  ;;  %2762 = vst.msk [vmem:[%s3982_s26 + $0x70] sm:$0xff] %vm2747_vm3, %v2745_v30  ;;  %v2177_v53 = vpop.f32.mrb[38].mxu0  ;;  %v2220_v18 = vpop.f32.mrb[38].mxu1 }
 0x29b   : > { %v2595_v25 = vcombine.low %v2451_v19, %v2453_v55  ;;  %v2596_v13 = vcombine.high %v2451_v19, %v2453_v55  ;;  %v2611_v9 = vcombine.low %v2452_v1, %v2454_v40  ;;  %v2612_v41 = vcombine.high %v2452_v1, %v2454_v40  ;;  %v3139_v59 = vpop.f32.mrb[39].mxu0  ;;  %v3145_v2 = vpop.f32.mrb[39].mxu1 }
 0x29c   : > { %v1104_v49 = vpop.xlane.xlu1 %1103  ;;  %v3408_v31 = vpop.eup %3407 }
 0x29d   : > { %v4835_v57 = vrot.slane %v2595_v25, %v4743_v16  ;;  %v4838_v0 = vrot.slane %v2596_v13, %v4743_v16  ;;  %v2619_v14 = vrot.slane %v2611_v9, %v4743_v16  ;;  %v4842_v38 = vrot.slane %v2612_v41, %v4743_v16  ;;  %v3410_v36 = vpop.eup %3409 }
 0x29e   : > { %3417 = vrcp.f32 %v1104_v49  ;;  %v3412_v54 = vpop.eup %3411 }
 0x29f   : > { %v2659_v56 = vcombine.low %v4835_v57, %v2619_v14  ;;  %v2660_v23 = vcombine.high %v4835_v57, %v2619_v14  ;;  %v2675_v7 = vcombine.low %v4838_v0, %v4842_v38  ;;  %v2676_v60 = vcombine.high %v4838_v0, %v4842_v38 }
 0x2a0   : > { %v2260_v45 = vpop.f32.mrb[40].mxu0  ;;  %v2303_v12 = vpop.f32.mrb[40].mxu1  ;;  %v2418_v48 = vmul.f32 %v3412_v54, %v4713_v21 }
 0x2a1   : > { %v3150_v11 = vpop.f32.mrb[41].mxu0  ;;  %v3156_v44 = vpop.f32.mrb[41].mxu1  ;;  %v2455_v46 = vmul.f32 %v3406_v15, %v2260_v45  ;;  %v2456_v34 = vmul.f32 %v3404_v51, %v2303_v12  ;;  %v2667_v2 = vrot.slane %v2659_v56, %v4776_v50 }
 0x2a2   : > { %v2263_v37 = vpop.f32.mrb[42].mxu0  ;;  %v2306_v58 = vpop.f32.mrb[42].mxu1 }
 0x2a3   : > { %v3151_v24 = vpop.f32.mrb[43].mxu0  ;;  %v3157_v20 = vpop.f32.mrb[43].mxu1 }
 0x2a4   : > { %v1110_v4 = vpop.xlane.xlu1 %1109  ;;  %v3414_v40 = vpop.eup %3413 }
 0x2a5   : > { %3419 = vrcp.f32 %v1110_v4  ;;  %v3416_v61 = vpop.eup %3415  ;;  %v2420_v41 = vmul.f32 %v3414_v40, %v4723_v28  ;;  %v2683_v28 = vrot.slane %v2675_v7, %v4776_v50 }
 0x2a6   : > { %v2422_v59 = vmul.f32 %v3416_v61, %v4725_v29  ;;  %v2690_v29 = vrot.slane %v2676_v60, %v4776_v50 }
 0x2a8   : > { %v2346_v27 = vpop.f32.mrb[44].mxu0  ;;  %v2389_v8 = vpop.f32.mrb[44].mxu1 }
 0x2a9   : > { %v2457_v3 = vmul.f32 %v3410_v36, %v2346_v27  ;;  %v2458_v5 = vmul.f32 %v3408_v31, %v2389_v8  ;;  %v3162_v35 = vpop.f32.mrb[45].mxu0  ;;  %v3168_v47 = vpop.f32.mrb[45].mxu1 }
 0x2aa   : > { %v2349_v26 = vpop.f32.mrb[46].mxu0  ;;  %v2392_v32 = vpop.f32.mrb[46].mxu1 }
 0x2ab   : > { %v2627_v22 = vcombine.low %v2455_v46, %v2457_v3  ;;  %v2628_v10 = vcombine.high %v2455_v46, %v2457_v3  ;;  %v2643_v6 = vcombine.low %v2456_v34, %v2458_v5  ;;  %v2644_v62 = vcombine.high %v2456_v34, %v2458_v5  ;;  %v3163_v30 = vpop.f32.mrb[47].mxu0  ;;  %v3169_v43 = vpop.f32.mrb[47].mxu1 }
 0x2ac   : > { %v3418_v9 = vpop.eup %3417 }
 0x2ad   : > { %v2635_v17 = vrot.slane %v2627_v22, %v4743_v16  ;;  %v2642_v19 = vrot.slane %v2628_v10, %v4743_v16  ;;  %v2651_v1 = vrot.slane %v2643_v6, %v4743_v16  ;;  %v2658_v55 = vrot.slane %v2644_v62, %v4743_v16 }
 0x2ae   : > { %v2674_v16 = vrot.slane %v2660_v23, %v4776_v50  ;;  %v2424_v12 = vmul.f32 %v3418_v9, %v4733_v39 }
 0x2af   : > { %v2691_v53 = vcombine.low %v2635_v17, %v2651_v1  ;;  %v2692_v18 = vcombine.high %v2635_v17, %v2651_v1  ;;  %v2707_v25 = vcombine.low %v2642_v19, %v2658_v55  ;;  %v2708_v13 = vcombine.high %v2642_v19, %v2658_v55  ;;  %v3420_v57 = vpop.eup %3419 }
 0x2b0   : > { %v2426_v11 = vmul.f32 %v3420_v57, %v4735_v42 }
 0x2b1   : > { %v2699_v21 = vrot.slane %v2691_v53, %v4776_v50  ;;  %v2706_v14 = vrot.slane %v2692_v18, %v4776_v50  ;;  %v2715_v49 = vrot.slane %v2707_v25, %v4776_v50  ;;  %v2722_v45 = vrot.slane %v2708_v13, %v4776_v50 }
 0x2b3   : > { %v2723_v56 = vcombine.low %v2667_v2, %v2699_v21  ;;  %v2724_v23 = vcombine.high %v2667_v2, %v2699_v21  ;;  %v2725_v44 = vcombine.low %v2674_v16, %v2706_v14  ;;  %v2726_v51 = vcombine.high %v2674_v16, %v2706_v14 }
 0x2b4   : > { %v2727_v39 = vcombine.low %v2683_v28, %v2715_v49  ;;  %v2728_v42 = vcombine.high %v2683_v28, %v2715_v49  ;;  %v2729_v37 = vcombine.low %v2690_v29, %v2722_v45  ;;  %v2730_v7 = vcombine.high %v2690_v29, %v2722_v45 }
 0x2b5   : > { %v2732_v58 = vadd.f32 %v2723_v56, %v4705_v63  ;;  %v2734_v50 = vadd.f32 %v2724_v23, %v4701_v52  ;;  %v2736_v0 = vadd.f32 %v2725_v44, %v4715_v33  ;;  %v2738_v38 = vadd.f32 %v2726_v51, %v2418_v48 }
 0x2b6   : > { %v2740_v60 = vadd.f32 %v2727_v39, %v2420_v41  ;;  %v2742_v63 = vadd.f32 %v2728_v42, %v2422_v59  ;;  %v2744_v24 = vadd.f32 %v2729_v37, %v2424_v12  ;;  %v2746_v20 = vadd.f32 %v2730_v7, %v2426_v11 }
 0x2b7   : > { %2749 = vst.msk [vmem:[%s3982_s26 + $0x8] sm:$0xff] %vm2747_vm3, %v2732_v58  ;;  %2751 = vst.msk [vmem:[%s3982_s26 + $0x18] sm:$0xff] %vm2747_vm3, %v2734_v50 }
 0x2b8   : > { %2753 = vst.msk [vmem:[%s3982_s26 + $0x28] sm:$0xff] %vm2747_vm3, %v2736_v0  ;;  %2755 = vst.msk [vmem:[%s3982_s26 + $0x38] sm:$0xff] %vm2747_vm3, %v2738_v38 }
 0x2b9   : > { %2757 = vst.msk [vmem:[%s3982_s26 + $0x48] sm:$0xff] %vm2747_vm3, %v2740_v60  ;;  %2759 = vst.msk [vmem:[%s3982_s26 + $0x58] sm:$0xff] %vm2747_vm3, %v2742_v63 }
 0x2ba   : > { %2761 = vst.msk [vmem:[%s3982_s26 + $0x68] sm:$0xff] %vm2747_vm3, %v2744_v24  ;;  %2763 = vst.msk [vmem:[%s3982_s26 + $0x78] sm:$0xff] %vm2747_vm3, %v2746_v20 }
 0x2bb   : > { %3524 = shalt.err (!%p3521_p5)
}
 0x2bc   : > { %s3525_s26 = scalar_lea.hbm %s4888_s27, 2048  ;;  %s3529_s18 = scalar_lea.hbm %s5021_s29, 8192 }
 0x2bd   : > { %p3526_p8 = scmp.ne.s32.totalorder %s4888_s27, %s3525_s26  ;;  %p3530_p9 = scmp.lt.u32.totalorder %s4888_s27, %s5021_s29 }
 0x2be   : > { %p3531_p11 = scmp.lt.u32.totalorder %s3529_s18, %s3525_s26  ;;  %p3533_p3 = scmp.lt.u32.totalorder %s3525_s26, %s4888_s27 }
 0x2bf   : > { %p3527_p4 = pnand %p3526_p8, %p5023_p10 }
 0x2c0   : > { %p3532_p13 = por %p3531_p11, %p3530_p9 }
 0x2c1   : > { %p3528_p7 = pneg %p3527_p4 }
 0x2c2   : > { %p3534_p12 = por %p3533_p3, %p3532_p13 }
 0x2c4   : > { %p3535_p6 = pnand %p3534_p12, %p3528_p7 }
 0x2c6   : > { %3538 = shalt.err (!%p3535_p6)
}
 0x2c7   : > { %s3656_s5 = smov 128   ;;  %s3657_s2 = smov 8  }
 0x2c8   : > { %3176 = dma.vmem_to_hbm [thread:$0]  (%p5023_p10), %s4890_s15, 2048, %s4888_s27, %s2765_s14, %s3656_s5, %s3656_s5, %s3657_s2  }
 0x2c9 PF: > { %s5024_s9 = sld [smem:[#allocation14_spill]]  ;;  %s5025_s7 = sld [smem:[#allocation20_spill]] }
 0x2ca   : > { %p3193_p2 = scmp.ge.s32.totalorder %s3641_s25, 2 }
 0x2cf   : > { %s2796_s0 = sand.u32 1, %s5024_s9   ;;  %p5026_p1 = scmp.ne.s32.totalorder %s5025_s7, 0 }
 0x2d0   : > { %s2797_s4 = scalar_lea.sflag [#allocation5], %s2796_s0 }
 0x2d1   : > { %p3189_p0 = pnand %p3193_p2, %p5026_p1 }
 0x2d3   : > { %3596 = dma.done.wait (!%p3189_p0), %s2797_s4, 2048  }
 0x2d4   : > { %3598 = vsyncadd (!%p3189_p0), %s2797_s4, 4294965248  ;;  %s23_s25 = sadd.s32 1, %s3641_s25   ;;  %s5027_s21 = sld [smem:[#allocation21_spill]] }
 0x2d5   : > { %p20_p5 = scmp.ge.s32.totalorder %s23_s25, 6   ;;  %s5028_s27 = sld [smem:[#allocation17_spill]] }
 0x2d6   : > { %s5029_s28 = sld [smem:[#allocation18_spill]]  ;;  %s5030_s15 = smov %s3605_s16 }
 0x2d7   : > { %s5031_s16 = smov %s3609_s17  ;;  %s5032_s17 = smov %s3897_s8 }
 0x2d8   : > { %s5033_s18 = smov %s3617_s19  ;;  %s5034_s19 = smov %s3621_s20 }
 0x2d9   : > { %s5037_s22 = smov %s3637_s24  ;;  %22 = sbr.rel (!%p20_p5) target bundleno = 15 (0xf), region = 111 }
 0x2da   : > { %s5035_s20 = smov %s5027_s21  ;;  %s5036_s21 = smov %s3633_s23 }
 0x2db   : > { %s5038_s23 = smov %s5028_s27 }
 0x2dc   : > { %s5039_s24 = smov %s5029_s28 }
 0x2e0   :  { %2802 = vsyncpa [#allocation4], 1 }
 0x2e1   :  { %2804 = vsyncpa [#allocation4 + $0x1], 1 }
 0x2e2   :  { %2805 = vsyncpa [#allocation7], 1 }
 0x2e3   :  { %2807 = vsyncpa [#allocation7 + $0x1], 1 }
 0x2e4   :  { %2808 = vsyncpa [#allocation5], 1 }
 0x2e5   :  { %2810 = vsyncpa [#allocation5 + $0x1], 1 }

</bundles_post_ra>
